<compile_context>
chip_gen: v7x
topology: tpu7x:2x2x1
jax: 0.10.0
libtpu: 0.0.40
codegen_flags: <defaults>
</compile_context>

<pallas_src>
import functools

import jax
import jax.numpy as jnp
from jax import lax
from jax.experimental import pallas as pl
from jax.experimental.pallas import tpu as pltpu

N_EMBD = 384
NUM_HEADS = 6
HEAD_SIZE = N_EMBD // NUM_HEADS  # 64
NEG_INF = -1e30  # finite big-negative: avoids exp(-inf - -inf) = NaN in masked rows


def mha_fused_kernel(x_ref, wq_ref, wkv_ref, wp_ref, bp_ref, o_ref,
                     kv_scr, q_scr, cat_scr, *, num_heads, head_size):
    """One (batch, q-tile) grid point: fused QKV + per-head causal attention + proj.

    x_ref  : (1, T, C)  bf16      wq_ref : (C, C)   bf16     wkv_ref : (C, 2C) bf16
    wp_ref : (C, C)     bf16      bp_ref : (1, C)   f32      o_ref   : (1, TQ, C) f32
    kv_scr : (T, 2C)    bf16      q_scr  : (TQ, C)  bf16     cat_scr : (TQ, C) f32
    """
    T = x_ref.shape[1]
    C = x_ref.shape[2]
    TQ = o_ref.shape[1]
    qi = pl.program_id(1)
    q_start = pl.multiple_of(qi * TQ, TQ)

    # Full-sequence K|V projection: computed once per batch (first q-tile),
    # cached in bf16 VMEM scratch, reused by every later q-tile of this batch.
    @pl.when(qi == 0)
    def _():
        kv = jnp.dot(x_ref[0], wkv_ref[...],
                     preferred_element_type=jnp.float32)                     # (T, 2C)
        kv_scr[...] = kv.astype(jnp.bfloat16)

    # Q projection for this query tile, with the softmax scale folded in once.
    # NOTE: the PyTorch module scales by C ** -0.5 (n_embd), not head_size ** -0.5.
    scale = C ** (-0.5)
    x_q = x_ref[0, pl.ds(q_start, TQ), :]                                    # (TQ, C)
    q = jnp.dot(x_q, wq_ref[...], preferred_element_type=jnp.float32) * scale
    q_scr[...] = q.astype(jnp.bfloat16)

    # Causal mask, hoisted out of the per-head loop.
    row = lax.broadcasted_iota(jnp.int32, (TQ, T), 0) + q_start
    col = lax.broadcasted_iota(jnp.int32, (TQ, T), 1)
    causal = col <= row

    for h in range(num_heads):
        lo = h * head_size
        hi = lo + head_size
        qh = q_scr[:, lo:hi]                                                 # (TQ, Hs) bf16
        kh = kv_scr[:, lo:hi]                                                # (T,  Hs) bf16
        vh = kv_scr[:, C + lo:C + hi]                                        # (T,  Hs) bf16

        # scores = qh @ kh.T (contract the head dim directly on the MXU).
        s = lax.dot_general(qh, kh, (((1,), (1,)), ((), ())),
                            preferred_element_type=jnp.float32)              # (TQ, T)
        s = jnp.where(causal, s, NEG_INF)

        # Numerically stable softmax (f32); reciprocal on the EUP slot.
        s = s - jnp.max(s, axis=-1, keepdims=True)
        p = jnp.exp(s)
        p = p * pl.reciprocal(jnp.sum(p, axis=-1, keepdims=True), approx=True)

        # Write this head's output straight into the concat scratch (no
        # jnp.concatenate -> no cross-lane relayout, bounded live ranges).
        cat_scr[:, lo:hi] = jnp.dot(p.astype(jnp.bfloat16), vh,
                                    preferred_element_type=jnp.float32)      # (TQ, Hs)

    # Fused output projection while the concatenated heads are still in VMEM.
    y = jnp.dot(cat_scr[...].astype(jnp.bfloat16), wp_ref[...],
                preferred_element_type=jnp.float32) + bp_ref[...]            # (TQ, C)
    o_ref[0] = y.astype(o_ref.dtype)


def _pick_query_tile(T, max_tq=256):
    """Largest query-row tile <= max_tq that divides T (keeps sublane alignment).

    256 is preferred on v6e/v7x (matches the 256-row MXU pass and collapses
    NQ to 1 for T <= block_size); cap at 128 on v5e if store bandwidth matters.
    """
    for cand in (256, 128, 64, 32, 16, 8):
        if cand <= max_tq and cand <= T and T % cand == 0:
            return cand
    return T


def multi_head_attention(x, wq, wk, wv, wp, bp, *, max_tq=256):
    """x: (B, T, C) f32.  wq/wk/wv: (H, C, Hs).  wp: (C, C).  bp: (C,)."""
    B, T, C = x.shape
    H, _, Hs = wq.shape
    TQ = _pick_query_tile(T, max_tq)
    NQ = T // TQ

    # Pre-concatenate per-head weights: x @ wq_cat == concat_h(x @ wq[h]) along cols.
    wq_cat = jnp.transpose(wq, (1, 0, 2)).reshape(C, H * Hs)                 # (C, C)
    wk_cat = jnp.transpose(wk, (1, 0, 2)).reshape(C, H * Hs)
    wv_cat = jnp.transpose(wv, (1, 0, 2)).reshape(C, H * Hs)
    wkv_cat = jnp.concatenate([wk_cat, wv_cat], axis=1)                      # (C, 2C)

    # bf16 MXU operands (halves HBM bytes); bias stays f32 (added post-accumulate).
    x_bf = x.astype(jnp.bfloat16)
    wq_bf = wq_cat.astype(jnp.bfloat16)
    wkv_bf = wkv_cat.astype(jnp.bfloat16)
    wp_bf = wp.astype(jnp.bfloat16)
    bp2 = bp.reshape(1, C).astype(jnp.float32)

    kernel = functools.partial(mha_fused_kernel, num_heads=H, head_size=Hs)

    out = pl.pallas_call(
        kernel,
        out_shape=jax.ShapeDtypeStruct((B, T, C), x.dtype),
        grid=(B, NQ),
        in_specs=[
            pl.BlockSpec((1, T, C), lambda b, qi: (b, 0, 0)),
            pl.BlockSpec((C, H * Hs), lambda b, qi: (0, 0)),
            pl.BlockSpec((C, 2 * H * Hs), lambda b, qi: (0, 0)),
            pl.BlockSpec((C, C), lambda b, qi: (0, 0)),
            pl.BlockSpec((1, C), lambda b, qi: (0, 0)),
        ],
        out_specs=pl.BlockSpec((1, TQ, C), lambda b, qi: (b, qi, 0)),
        scratch_shapes=[
            pltpu.VMEM((T, 2 * C), jnp.bfloat16),   # cached K|V for this batch
            pltpu.VMEM((TQ, C), jnp.bfloat16),      # scaled Q (bf16, cast once)
            pltpu.VMEM((TQ, C), jnp.float32),       # concatenated head outputs
        ],
        # Batch axis parallel (megacore on v7x); q-tile axis must be
        # "arbitrary" because the cached KV scratch carries across q-tiles.
        compiler_params=pltpu.CompilerParams(
            dimension_semantics=("parallel", "arbitrary")),
    )(x_bf, wq_bf, wkv_bf, wp_bf, bp2)

    return out


def reference_jax(x, wq, wk, wv, wp, bp):
    """Plain-JAX f32 reference mirroring the PyTorch forward (eval mode)."""
    B, T, C = x.shape
    outs = []
    for h in range(wq.shape[0]):
        q = x @ wq[h]
        k = x @ wk[h]
        v = x @ wv[h]
        wei = (q @ jnp.swapaxes(k, -2, -1)) * (C ** -0.5)
        mask = jnp.tril(jnp.ones((T, T), dtype=bool))
        wei = jnp.where(mask, wei, -jnp.inf)
        wei = jax.nn.softmax(wei, axis=-1)
        outs.append(wei @ v)
    cat = jnp.concatenate(outs, axis=-1)
    return cat @ wp + bp


if __name__ == "__main__":
    key = jax.random.PRNGKey(0)
    kx, kq, kk, kv, kp, kb = jax.random.split(key, 6)

    # PyTorch nn.Linear(n_embd, head_size, bias=False) weight is (head_size, n_embd);
    # we store the transpose (C, Hs), stacked over heads.
    wq = jax.random.normal(kq, (NUM_HEADS, N_EMBD, HEAD_SIZE), jnp.float32) * 0.02
    wk = jax.random.normal(kk, (NUM_HEADS, N_EMBD, HEAD_SIZE), jnp.float32) * 0.02
    wv = jax.random.normal(kv, (NUM_HEADS, N_EMBD, HEAD_SIZE), jnp.float32) * 0.02
    wp = jax.random.normal(kp, (N_EMBD, N_EMBD), jnp.float32) * 0.02
    bp = jax.random.normal(kb, (N_EMBD,), jnp.float32) * 0.02

    # Main check: B=2, T=8 (single q-tile per batch, NQ == 1).
    B, T = 2, 8  # T <= block_size (256)
    x = jax.random.normal(kx, (B, T, N_EMBD), dtype=jnp.float32)
    out = jax.block_until_ready(multi_head_attention(x, wq, wk, wv, wp, bp))
    ref = reference_jax(x, wq, wk, wv, wp, bp)
    assert out.shape == (B, T, N_EMBD)
    # bf16 MXU operands with f32 accumulation -> loose tolerance vs f32 reference.
    assert jnp.allclose(out, ref, atol=2e-2, rtol=2e-2), "mismatch vs reference (T=8)"

    # Second check exercises the NQ > 1 path (cached-KV scratch + arbitrary qi axis).
    T2 = 16
    x2 = jax.random.normal(kx, (B, T2, N_EMBD), dtype=jnp.float32)
    out2 = jax.block_until_ready(
        multi_head_attention(x2, wq, wk, wv, wp, bp, max_tq=8))
    ref2 = reference_jax(x2, wq, wk, wv, wp, bp)
    assert out2.shape == (B, T2, N_EMBD)
    assert jnp.allclose(out2, ref2, atol=2e-2, rtol=2e-2), "mismatch vs reference (T=16)"

    print("KERNEL_OK")
</pallas_src>

<mosaic_0001>
module attributes {stable_mosaic.version = 11 : i64} {
  func.func @mha_fused_kernel(%arg0: i32, %arg1: i32, %arg2: memref<1x8x384xbf16, #tpu.memory_space<vmem>>, %arg3: memref<384x384xbf16, #tpu.memory_space<vmem>>, %arg4: memref<384x768xbf16, #tpu.memory_space<vmem>>, %arg5: memref<384x384xbf16, #tpu.memory_space<vmem>>, %arg6: memref<1x384xf32, #tpu.memory_space<vmem>>, %arg7: memref<1x8x384xf32, #tpu.memory_space<vmem>>, %arg8: memref<8x768xbf16, #tpu.memory_space<vmem>>, %arg9: memref<8x384xbf16, #tpu.memory_space<vmem>>, %arg10: memref<8x384xf32, #tpu.memory_space<vmem>>) attributes {dimension_semantics = [#tpu.dimension_semantics<parallel>, #tpu.dimension_semantics<arbitrary>], iteration_bounds = array<i64: 2, 1>, scalar_prefetch = 0 : i64, scratch_operands = 3 : i64, tpu.core_type = #tpu.core_type<tc>, window_params = [{transform_indices = @transform_0, window_bounds = array<i64: 1, 8, 384>}, {pipeline_mode = #tpu.pipeline_mode<synchronous>, transform_indices = @transform_1, window_bounds = array<i64: 384, 384>}, {pipeline_mode = #tpu.pipeline_mode<synchronous>, transform_indices = @transform_2, window_bounds = array<i64: 384, 768>}, {pipeline_mode = #tpu.pipeline_mode<synchronous>, transform_indices = @transform_3, window_bounds = array<i64: 384, 384>}, {pipeline_mode = #tpu.pipeline_mode<synchronous>, transform_indices = @transform_4, window_bounds = array<i64: 1, 384>}, {transform_indices = @transform_5, window_bounds = array<i64: 1, 8, 384>}]} {
    %c8_i32 = arith.constant 8 : i32
    %0 = arith.muli %arg1, %c8_i32 : i32
    %1 = tpu.assume_multiple %0, 8 : i32
    %c0_i32 = arith.constant 0 : i32
    %2 = arith.cmpi eq, %arg1, %c0_i32 : i32
    %3 = arith.extui %2 : i1 to i32
    %c0_i32_0 = arith.constant 0 : i32
    %4 = arith.cmpi ne, %3, %c0_i32_0 : i32
    scf.if %4 {
      %c0_84 = arith.constant 0 : index
      %c0_85 = arith.constant 0 : index
      %c0_86 = arith.constant 0 : index
      %143 = vector.load %arg2[%c0_84, %c0_85, %c0_86] : memref<1x8x384xbf16, #tpu.memory_space<vmem>>, vector<1x8x384xbf16>
      %144 = vector.shape_cast %143 : vector<1x8x384xbf16> to vector<8x384xbf16>
      %c0_87 = arith.constant 0 : index
      %c0_88 = arith.constant 0 : index
      %145 = vector.load %arg4[%c0_87, %c0_88] : memref<384x768xbf16, #tpu.memory_space<vmem>>, vector<384x768xbf16>
      %cst_89 = arith.constant dense<0.000000e+00> : vector<8x768xf32>
      %146 = tpu.matmul %144, %145, %cst_89 {dimension_numbers = #tpu.dot_dimension_numbers<[1], [0], [0], [1], [0, 0, 1, 1], [], []>} : vector<8x384xbf16>, vector<384x768xbf16>, vector<8x768xf32> -> vector<8x768xf32>
      %147 = arith.truncf %146 : vector<8x768xf32> to vector<8x768xbf16>
      %c0_90 = arith.constant 0 : index
      %c0_91 = arith.constant 0 : index
      %148 = vector.load %arg8[%c0_90, %c0_91] : memref<8x768xbf16, #tpu.memory_space<vmem>>, vector<8x768xbf16>
      tpu.vector_store %arg8[%c0_90, %c0_91], %147 {strides = array<i32>} : memref<8x768xbf16, #tpu.memory_space<vmem>>, vector<8x768xbf16>,
    } else {
    }
    %c0 = arith.constant 0 : index
    %5 = arith.index_cast %1 : i32 to index
    %c0_1 = arith.constant 0 : index
    %6 = vector.load %arg2[%c0, %5, %c0_1] : memref<1x8x384xbf16, #tpu.memory_space<vmem>>, vector<1x8x384xbf16>
    %7 = vector.shape_cast %6 : vector<1x8x384xbf16> to vector<8x384xbf16>
    %c0_2 = arith.constant 0 : index
    %c0_3 = arith.constant 0 : index
    %8 = vector.load %arg3[%c0_2, %c0_3] : memref<384x384xbf16, #tpu.memory_space<vmem>>, vector<384x384xbf16>
    %cst = arith.constant dense<0.000000e+00> : vector<8x384xf32>
    %9 = tpu.matmul %7, %8, %cst {dimension_numbers = #tpu.dot_dimension_numbers<[1], [0], [0], [1], [0, 0, 1, 1], [], []>} : vector<8x384xbf16>, vector<384x384xbf16>, vector<8x384xf32> -> vector<8x384xf32>
    %cst_4 = arith.constant 0.0510310382 : f32
    %10 = vector.broadcast %cst_4 : f32 to vector<8x384xf32>
    %11 = arith.mulf %9, %10 : vector<8x384xf32>
    %12 = arith.truncf %11 : vector<8x384xf32> to vector<8x384xbf16>
    %c0_5 = arith.constant 0 : index
    %c0_6 = arith.constant 0 : index
    %13 = vector.load %arg9[%c0_5, %c0_6] : memref<8x384xbf16, #tpu.memory_space<vmem>>, vector<8x384xbf16>
    tpu.vector_store %arg9[%c0_5, %c0_6], %12 {strides = array<i32>} : memref<8x384xbf16, #tpu.memory_space<vmem>>, vector<8x384xbf16>,
    %14 = tpu.iota {dimensions = array<i32: 0>} : vector<8x8xi32>
    %15 = vector.broadcast %1 : i32 to vector<8x8xi32>
    %16 = arith.addi %14, %15 : vector<8x8xi32>
    %17 = tpu.iota {dimensions = array<i32: 1>} : vector<8x8xi32>
    %18 = arith.cmpi sle, %17, %16 : vector<8x8xi32>
    %c0_7 = arith.constant 0 : index
    %c0_8 = arith.constant 0 : index
    %19 = vector.load %arg9[%c0_7, %c0_8] : memref<8x384xbf16, #tpu.memory_space<vmem>>, vector<8x64xbf16>
    %c0_9 = arith.constant 0 : index
    %c0_10 = arith.constant 0 : index
    %20 = vector.load %arg8[%c0_9, %c0_10] : memref<8x768xbf16, #tpu.memory_space<vmem>>, vector<8x64xbf16>
    %c0_11 = arith.constant 0 : index
    %c384 = arith.constant 384 : index
    %21 = vector.load %arg8[%c0_11, %c384] : memref<8x768xbf16, #tpu.memory_space<vmem>>, vector<8x64xbf16>
    %cst_12 = arith.constant dense<0.000000e+00> : vector<8x8xf32>
    %22 = tpu.matmul %19, %20, %cst_12 {dimension_numbers = #tpu.dot_dimension_numbers<[1], [1], [0], [0], [0, 0, 1, 0], [], []>} : vector<8x64xbf16>, vector<8x64xbf16>, vector<8x8xf32> -> vector<8x8xf32>
    %cst_13 = arith.constant -1.000000e+30 : f32
    %23 = vector.broadcast %cst_13 : f32 to vector<8x8xf32>
    %24 = arith.select %18, %22, %23 : vector<8x8xi1>, vector<8x8xf32>
    %cst_14 = arith.constant dense<0xFF800000> : vector<8xf32>
    %25 = vector.multi_reduction <maximumf>, %24, %cst_14 [1] : vector<8x8xf32> to vector<8xf32>
    %26 = vector.shape_cast %25 : vector<8xf32> to vector<8x1xf32>
    %27 = vector.broadcast %26 : vector<8x1xf32> to vector<8x8xf32>
    %28 = arith.subf %24, %27 : vector<8x8xf32>
    %29 = math.exp %28 : vector<8x8xf32>
    %cst_15 = arith.constant dense<0.000000e+00> : vector<8xf32>
    %30 = vector.multi_reduction <add>, %29, %cst_15 [1] : vector<8x8xf32> to vector<8xf32>
    %31 = vector.shape_cast %30 : vector<8xf32> to vector<8x1xf32>
    %32 = tpu.reciprocal %31 {approx = true} : vector<8x1xf32> -> vector<8x1xf32>
    %33 = vector.broadcast %32 : vector<8x1xf32> to vector<8x8xf32>
    %34 = arith.mulf %29, %33 : vector<8x8xf32>
    %35 = arith.truncf %34 : vector<8x8xf32> to vector<8x8xbf16>
    %cst_16 = arith.constant dense<0.000000e+00> : vector<8x64xf32>
    %36 = tpu.matmul %35, %21, %cst_16 {dimension_numbers = #tpu.dot_dimension_numbers<[1], [0], [0], [1], [0, 0, 1, 1], [], []>} : vector<8x8xbf16>, vector<8x64xbf16>, vector<8x64xf32> -> vector<8x64xf32>
    %c0_17 = arith.constant 0 : index
    %c0_18 = arith.constant 0 : index
    %37 = vector.load %arg10[%c0_17, %c0_18] : memref<8x384xf32, #tpu.memory_space<vmem>>, vector<8x64xf32>
    tpu.vector_store %arg10[%c0_17, %c0_18], %36 {strides = array<i32>} : memref<8x384xf32, #tpu.memory_space<vmem>>, vector<8x64xf32>,
    %c0_19 = arith.constant 0 : index
    %c64 = arith.constant 64 : index
    %38 = vector.load %arg9[%c0_19, %c64] : memref<8x384xbf16, #tpu.memory_space<vmem>>, vector<8x64xbf16>
    %c0_20 = arith.constant 0 : index
    %c64_21 = arith.constant 64 : index
    %39 = vector.load %arg8[%c0_20, %c64_21] : memref<8x768xbf16, #tpu.memory_space<vmem>>, vector<8x64xbf16>
    %c0_22 = arith.constant 0 : index
    %c448 = arith.constant 448 : index
    %40 = vector.load %arg8[%c0_22, %c448] : memref<8x768xbf16, #tpu.memory_space<vmem>>, vector<8x64xbf16>
    %cst_23 = arith.constant dense<0.000000e+00> : vector<8x8xf32>
    %41 = tpu.matmul %38, %39, %cst_23 {dimension_numbers = #tpu.dot_dimension_numbers<[1], [1], [0], [0], [0, 0, 1, 0], [], []>} : vector<8x64xbf16>, vector<8x64xbf16>, vector<8x8xf32> -> vector<8x8xf32>
    %cst_24 = arith.constant -1.000000e+30 : f32
    %42 = vector.broadcast %cst_24 : f32 to vector<8x8xf32>
    %43 = arith.select %18, %41, %42 : vector<8x8xi1>, vector<8x8xf32>
    %cst_25 = arith.constant dense<0xFF800000> : vector<8xf32>
    %44 = vector.multi_reduction <maximumf>, %43, %cst_25 [1] : vector<8x8xf32> to vector<8xf32>
    %45 = vector.shape_cast %44 : vector<8xf32> to vector<8x1xf32>
    %46 = vector.broadcast %45 : vector<8x1xf32> to vector<8x8xf32>
    %47 = arith.subf %43, %46 : vector<8x8xf32>
    %48 = math.exp %47 : vector<8x8xf32>
    %cst_26 = arith.constant dense<0.000000e+00> : vector<8xf32>
    %49 = vector.multi_reduction <add>, %48, %cst_26 [1] : vector<8x8xf32> to vector<8xf32>
    %50 = vector.shape_cast %49 : vector<8xf32> to vector<8x1xf32>
    %51 = tpu.reciprocal %50 {approx = true} : vector<8x1xf32> -> vector<8x1xf32>
    %52 = vector.broadcast %51 : vector<8x1xf32> to vector<8x8xf32>
    %53 = arith.mulf %48, %52 : vector<8x8xf32>
    %54 = arith.truncf %53 : vector<8x8xf32> to vector<8x8xbf16>
    %cst_27 = arith.constant dense<0.000000e+00> : vector<8x64xf32>
    %55 = tpu.matmul %54, %40, %cst_27 {dimension_numbers = #tpu.dot_dimension_numbers<[1], [0], [0], [1], [0, 0, 1, 1], [], []>} : vector<8x8xbf16>, vector<8x64xbf16>, vector<8x64xf32> -> vector<8x64xf32>
    %c0_28 = arith.constant 0 : index
    %c64_29 = arith.constant 64 : index
    %56 = vector.load %arg10[%c0_28, %c64_29] : memref<8x384xf32, #tpu.memory_space<vmem>>, vector<8x64xf32>
    tpu.vector_store %arg10[%c0_28, %c64_29], %55 {strides = array<i32>} : memref<8x384xf32, #tpu.memory_space<vmem>>, vector<8x64xf32>,
    %c0_30 = arith.constant 0 : index
    %c128 = arith.constant 128 : index
    %57 = vector.load %arg9[%c0_30, %c128] : memref<8x384xbf16, #tpu.memory_space<vmem>>, vector<8x64xbf16>
    %c0_31 = arith.constant 0 : index
    %c128_32 = arith.constant 128 : index
    %58 = vector.load %arg8[%c0_31, %c128_32] : memref<8x768xbf16, #tpu.memory_space<vmem>>, vector<8x64xbf16>
    %c0_33 = arith.constant 0 : index
    %c512 = arith.constant 512 : index
    %59 = vector.load %arg8[%c0_33, %c512] : memref<8x768xbf16, #tpu.memory_space<vmem>>, vector<8x64xbf16>
    %cst_34 = arith.constant dense<0.000000e+00> : vector<8x8xf32>
    %60 = tpu.matmul %57, %58, %cst_34 {dimension_numbers = #tpu.dot_dimension_numbers<[1], [1], [0], [0], [0, 0, 1, 0], [], []>} : vector<8x64xbf16>, vector<8x64xbf16>, vector<8x8xf32> -> vector<8x8xf32>
    %cst_35 = arith.constant -1.000000e+30 : f32
    %61 = vector.broadcast %cst_35 : f32 to vector<8x8xf32>
    %62 = arith.select %18, %60, %61 : vector<8x8xi1>, vector<8x8xf32>
    %cst_36 = arith.constant dense<0xFF800000> : vector<8xf32>
    %63 = vector.multi_reduction <maximumf>, %62, %cst_36 [1] : vector<8x8xf32> to vector<8xf32>
    %64 = vector.shape_cast %63 : vector<8xf32> to vector<8x1xf32>
    %65 = vector.broadcast %64 : vector<8x1xf32> to vector<8x8xf32>
    %66 = arith.subf %62, %65 : vector<8x8xf32>
    %67 = math.exp %66 : vector<8x8xf32>
    %cst_37 = arith.constant dense<0.000000e+00> : vector<8xf32>
    %68 = vector.multi_reduction <add>, %67, %cst_37 [1] : vector<8x8xf32> to vector<8xf32>
    %69 = vector.shape_cast %68 : vector<8xf32> to vector<8x1xf32>
    %70 = tpu.reciprocal %69 {approx = true} : vector<8x1xf32> -> vector<8x1xf32>
    %71 = vector.broadcast %70 : vector<8x1xf32> to vector<8x8xf32>
    %72 = arith.mulf %67, %71 : vector<8x8xf32>
    %73 = arith.truncf %72 : vector<8x8xf32> to vector<8x8xbf16>
    %cst_38 = arith.constant dense<0.000000e+00> : vector<8x64xf32>
    %74 = tpu.matmul %73, %59, %cst_38 {dimension_numbers = #tpu.dot_dimension_numbers<[1], [0], [0], [1], [0, 0, 1, 1], [], []>} : vector<8x8xbf16>, vector<8x64xbf16>, vector<8x64xf32> -> vector<8x64xf32>
    %c0_39 = arith.constant 0 : index
    %c128_40 = arith.constant 128 : index
    %75 = vector.load %arg10[%c0_39, %c128_40] : memref<8x384xf32, #tpu.memory_space<vmem>>, vector<8x64xf32>
    tpu.vector_store %arg10[%c0_39, %c128_40], %74 {strides = array<i32>} : memref<8x384xf32, #tpu.memory_space<vmem>>, vector<8x64xf32>,
    %c0_41 = arith.constant 0 : index
    %c192 = arith.constant 192 : index
    %76 = vector.load %arg9[%c0_41, %c192] : memref<8x384xbf16, #tpu.memory_space<vmem>>, vector<8x64xbf16>
    %c0_42 = arith.constant 0 : index
    %c192_43 = arith.constant 192 : index
    %77 = vector.load %arg8[%c0_42, %c192_43] : memref<8x768xbf16, #tpu.memory_space<vmem>>, vector<8x64xbf16>
    %c0_44 = arith.constant 0 : index
    %c576 = arith.constant 576 : index
    %78 = vector.load %arg8[%c0_44, %c576] : memref<8x768xbf16, #tpu.memory_space<vmem>>, vector<8x64xbf16>
    %cst_45 = arith.constant dense<0.000000e+00> : vector<8x8xf32>
    %79 = tpu.matmul %76, %77, %cst_45 {dimension_numbers = #tpu.dot_dimension_numbers<[1], [1], [0], [0], [0, 0, 1, 0], [], []>} : vector<8x64xbf16>, vector<8x64xbf16>, vector<8x8xf32> -> vector<8x8xf32>
    %cst_46 = arith.constant -1.000000e+30 : f32
    %80 = vector.broadcast %cst_46 : f32 to vector<8x8xf32>
    %81 = arith.select %18, %79, %80 : vector<8x8xi1>, vector<8x8xf32>
    %cst_47 = arith.constant dense<0xFF800000> : vector<8xf32>
    %82 = vector.multi_reduction <maximumf>, %81, %cst_47 [1] : vector<8x8xf32> to vector<8xf32>
    %83 = vector.shape_cast %82 : vector<8xf32> to vector<8x1xf32>
    %84 = vector.broadcast %83 : vector<8x1xf32> to vector<8x8xf32>
    %85 = arith.subf %81, %84 : vector<8x8xf32>
    %86 = math.exp %85 : vector<8x8xf32>
    %cst_48 = arith.constant dense<0.000000e+00> : vector<8xf32>
    %87 = vector.multi_reduction <add>, %86, %cst_48 [1] : vector<8x8xf32> to vector<8xf32>
    %88 = vector.shape_cast %87 : vector<8xf32> to vector<8x1xf32>
    %89 = tpu.reciprocal %88 {approx = true} : vector<8x1xf32> -> vector<8x1xf32>
    %90 = vector.broadcast %89 : vector<8x1xf32> to vector<8x8xf32>
    %91 = arith.mulf %86, %90 : vector<8x8xf32>
    %92 = arith.truncf %91 : vector<8x8xf32> to vector<8x8xbf16>
    %cst_49 = arith.constant dense<0.000000e+00> : vector<8x64xf32>
    %93 = tpu.matmul %92, %78, %cst_49 {dimension_numbers = #tpu.dot_dimension_numbers<[1], [0], [0], [1], [0, 0, 1, 1], [], []>} : vector<8x8xbf16>, vector<8x64xbf16>, vector<8x64xf32> -> vector<8x64xf32>
    %c0_50 = arith.constant 0 : index
    %c192_51 = arith.constant 192 : index
    %94 = vector.load %arg10[%c0_50, %c192_51] : memref<8x384xf32, #tpu.memory_space<vmem>>, vector<8x64xf32>
    tpu.vector_store %arg10[%c0_50, %c192_51], %93 {strides = array<i32>} : memref<8x384xf32, #tpu.memory_space<vmem>>, vector<8x64xf32>,
    %c0_52 = arith.constant 0 : index
    %c256 = arith.constant 256 : index
    %95 = vector.load %arg9[%c0_52, %c256] : memref<8x384xbf16, #tpu.memory_space<vmem>>, vector<8x64xbf16>
    %c0_53 = arith.constant 0 : index
    %c256_54 = arith.constant 256 : index
    %96 = vector.load %arg8[%c0_53, %c256_54] : memref<8x768xbf16, #tpu.memory_space<vmem>>, vector<8x64xbf16>
    %c0_55 = arith.constant 0 : index
    %c640 = arith.constant 640 : index
    %97 = vector.load %arg8[%c0_55, %c640] : memref<8x768xbf16, #tpu.memory_space<vmem>>, vector<8x64xbf16>
    %cst_56 = arith.constant dense<0.000000e+00> : vector<8x8xf32>
    %98 = tpu.matmul %95, %96, %cst_56 {dimension_numbers = #tpu.dot_dimension_numbers<[1], [1], [0], [0], [0, 0, 1, 0], [], []>} : vector<8x64xbf16>, vector<8x64xbf16>, vector<8x8xf32> -> vector<8x8xf32>
    %cst_57 = arith.constant -1.000000e+30 : f32
    %99 = vector.broadcast %cst_57 : f32 to vector<8x8xf32>
    %100 = arith.select %18, %98, %99 : vector<8x8xi1>, vector<8x8xf32>
    %cst_58 = arith.constant dense<0xFF800000> : vector<8xf32>
    %101 = vector.multi_reduction <maximumf>, %100, %cst_58 [1] : vector<8x8xf32> to vector<8xf32>
    %102 = vector.shape_cast %101 : vector<8xf32> to vector<8x1xf32>
    %103 = vector.broadcast %102 : vector<8x1xf32> to vector<8x8xf32>
    %104 = arith.subf %100, %103 : vector<8x8xf32>
    %105 = math.exp %104 : vector<8x8xf32>
    %cst_59 = arith.constant dense<0.000000e+00> : vector<8xf32>
    %106 = vector.multi_reduction <add>, %105, %cst_59 [1] : vector<8x8xf32> to vector<8xf32>
    %107 = vector.shape_cast %106 : vector<8xf32> to vector<8x1xf32>
    %108 = tpu.reciprocal %107 {approx = true} : vector<8x1xf32> -> vector<8x1xf32>
    %109 = vector.broadcast %108 : vector<8x1xf32> to vector<8x8xf32>
    %110 = arith.mulf %105, %109 : vector<8x8xf32>
    %111 = arith.truncf %110 : vector<8x8xf32> to vector<8x8xbf16>
    %cst_60 = arith.constant dense<0.000000e+00> : vector<8x64xf32>
    %112 = tpu.matmul %111, %97, %cst_60 {dimension_numbers = #tpu.dot_dimension_numbers<[1], [0], [0], [1], [0, 0, 1, 1], [], []>} : vector<8x8xbf16>, vector<8x64xbf16>, vector<8x64xf32> -> vector<8x64xf32>
    %c0_61 = arith.constant 0 : index
    %c256_62 = arith.constant 256 : index
    %113 = vector.load %arg10[%c0_61, %c256_62] : memref<8x384xf32, #tpu.memory_space<vmem>>, vector<8x64xf32>
    tpu.vector_store %arg10[%c0_61, %c256_62], %112 {strides = array<i32>} : memref<8x384xf32, #tpu.memory_space<vmem>>, vector<8x64xf32>,
    %c0_63 = arith.constant 0 : index
    %c320 = arith.constant 320 : index
    %114 = vector.load %arg9[%c0_63, %c320] : memref<8x384xbf16, #tpu.memory_space<vmem>>, vector<8x64xbf16>
    %c0_64 = arith.constant 0 : index
    %c320_65 = arith.constant 320 : index
    %115 = vector.load %arg8[%c0_64, %c320_65] : memref<8x768xbf16, #tpu.memory_space<vmem>>, vector<8x64xbf16>
    %c0_66 = arith.constant 0 : index
    %c704 = arith.constant 704 : index
    %116 = vector.load %arg8[%c0_66, %c704] : memref<8x768xbf16, #tpu.memory_space<vmem>>, vector<8x64xbf16>
    %cst_67 = arith.constant dense<0.000000e+00> : vector<8x8xf32>
    %117 = tpu.matmul %114, %115, %cst_67 {dimension_numbers = #tpu.dot_dimension_numbers<[1], [1], [0], [0], [0, 0, 1, 0], [], []>} : vector<8x64xbf16>, vector<8x64xbf16>, vector<8x8xf32> -> vector<8x8xf32>
    %cst_68 = arith.constant -1.000000e+30 : f32
    %118 = vector.broadcast %cst_68 : f32 to vector<8x8xf32>
    %119 = arith.select %18, %117, %118 : vector<8x8xi1>, vector<8x8xf32>
    %cst_69 = arith.constant dense<0xFF800000> : vector<8xf32>
    %120 = vector.multi_reduction <maximumf>, %119, %cst_69 [1] : vector<8x8xf32> to vector<8xf32>
    %121 = vector.shape_cast %120 : vector<8xf32> to vector<8x1xf32>
    %122 = vector.broadcast %121 : vector<8x1xf32> to vector<8x8xf32>
    %123 = arith.subf %119, %122 : vector<8x8xf32>
    %124 = math.exp %123 : vector<8x8xf32>
    %cst_70 = arith.constant dense<0.000000e+00> : vector<8xf32>
    %125 = vector.multi_reduction <add>, %124, %cst_70 [1] : vector<8x8xf32> to vector<8xf32>
    %126 = vector.shape_cast %125 : vector<8xf32> to vector<8x1xf32>
    %127 = tpu.reciprocal %126 {approx = true} : vector<8x1xf32> -> vector<8x1xf32>
    %128 = vector.broadcast %127 : vector<8x1xf32> to vector<8x8xf32>
    %129 = arith.mulf %124, %128 : vector<8x8xf32>
    %130 = arith.truncf %129 : vector<8x8xf32> to vector<8x8xbf16>
    %cst_71 = arith.constant dense<0.000000e+00> : vector<8x64xf32>
    %131 = tpu.matmul %130, %116, %cst_71 {dimension_numbers = #tpu.dot_dimension_numbers<[1], [0], [0], [1], [0, 0, 1, 1], [], []>} : vector<8x8xbf16>, vector<8x64xbf16>, vector<8x64xf32> -> vector<8x64xf32>
    %c0_72 = arith.constant 0 : index
    %c320_73 = arith.constant 320 : index
    %132 = vector.load %arg10[%c0_72, %c320_73] : memref<8x384xf32, #tpu.memory_space<vmem>>, vector<8x64xf32>
    tpu.vector_store %arg10[%c0_72, %c320_73], %131 {strides = array<i32>} : memref<8x384xf32, #tpu.memory_space<vmem>>, vector<8x64xf32>,
    %c0_74 = arith.constant 0 : index
    %c0_75 = arith.constant 0 : index
    %133 = vector.load %arg10[%c0_74, %c0_75] : memref<8x384xf32, #tpu.memory_space<vmem>>, vector<8x384xf32>
    %134 = arith.truncf %133 : vector<8x384xf32> to vector<8x384xbf16>
    %c0_76 = arith.constant 0 : index
    %c0_77 = arith.constant 0 : index
    %135 = vector.load %arg5[%c0_76, %c0_77] : memref<384x384xbf16, #tpu.memory_space<vmem>>, vector<384x384xbf16>
    %cst_78 = arith.constant dense<0.000000e+00> : vector<8x384xf32>
    %136 = tpu.matmul %134, %135, %cst_78 {dimension_numbers = #tpu.dot_dimension_numbers<[1], [0], [0], [1], [0, 0, 1, 1], [], []>} : vector<8x384xbf16>, vector<384x384xbf16>, vector<8x384xf32> -> vector<8x384xf32>
    %c0_79 = arith.constant 0 : index
    %c0_80 = arith.constant 0 : index
    %137 = vector.load %arg6[%c0_79, %c0_80] : memref<1x384xf32, #tpu.memory_space<vmem>>, vector<1x384xf32>
    %138 = vector.broadcast %137 : vector<1x384xf32> to vector<8x384xf32>
    %139 = arith.addf %136, %138 : vector<8x384xf32>
    %c0_81 = arith.constant 0 : index
    %c0_82 = arith.constant 0 : index
    %c0_83 = arith.constant 0 : index
    %140 = vector.load %arg7[%c0_81, %c0_82, %c0_83] : memref<1x8x384xf32, #tpu.memory_space<vmem>>, vector<1x8x384xf32>
    %141 = vector.shape_cast %140 : vector<1x8x384xf32> to vector<8x384xf32>
    %142 = vector.shape_cast %139 : vector<8x384xf32> to vector<1x8x384xf32>
    tpu.vector_store %arg7[%c0_81, %c0_82, %c0_83], %142 {strides = array<i32>} : memref<1x8x384xf32, #tpu.memory_space<vmem>>, vector<1x8x384xf32>,
    return
  }
  func.func @transform_0(%arg0: i32, %arg1: i32) -> (i32, i32, i32) {
    %c0_i32 = arith.constant 0 : i32
    %c0_i32_0 = arith.constant 0 : i32
    %c0_i32_1 = arith.constant 0 : i32
    return %arg0, %c0_i32, %c0_i32_0 : i32, i32, i32
  }
  func.func @transform_1(%arg0: i32, %arg1: i32) -> (i32, i32) {
    %c0_i32 = arith.constant 0 : i32
    %c0_i32_0 = arith.constant 0 : i32
    %c0_i32_1 = arith.constant 0 : i32
    return %c0_i32, %c0_i32_0 : i32, i32
  }
  func.func @transform_2(%arg0: i32, %arg1: i32) -> (i32, i32) {
    %c0_i32 = arith.constant 0 : i32
    %c0_i32_0 = arith.constant 0 : i32
    %c0_i32_1 = arith.constant 0 : i32
    return %c0_i32, %c0_i32_0 : i32, i32
  }
  func.func @transform_3(%arg0: i32, %arg1: i32) -> (i32, i32) {
    %c0_i32 = arith.constant 0 : i32
    %c0_i32_0 = arith.constant 0 : i32
    %c0_i32_1 = arith.constant 0 : i32
    return %c0_i32, %c0_i32_0 : i32, i32
  }
  func.func @transform_4(%arg0: i32, %arg1: i32) -> (i32, i32) {
    %c0_i32 = arith.constant 0 : i32
    %c0_i32_0 = arith.constant 0 : i32
    %c0_i32_1 = arith.constant 0 : i32
    return %c0_i32, %c0_i32_0 : i32, i32
  }
  func.func @transform_5(%arg0: i32, %arg1: i32) -> (i32, i32, i32) {
    %c0_i32 = arith.constant 0 : i32
    %c0_i32_0 = arith.constant 0 : i32
    return %arg0, %arg1, %c0_i32 : i32, i32, i32
  }
}

</mosaic_0001>

<bundles_post_ra>
// kernel: tpu_custom_call.1
= control target key start
LH: loop header
LB: loop body
LE: loop exit
PB: predicated region body
PF: predicated region fallthrough
CT: control target
= control target key end

     0   :  { %s5463_s0 = inlined_call_operand.hbm [shape: bf16[2,8,384], index: 0, kind: input, shape index: {}]   ;;  %s5464_s1 = inlined_call_operand.hbm [shape: bf16[384,384], index: 1, kind: input, shape index: {}]   ;;  %s5465_s2 = inlined_call_operand.hbm [shape: bf16[384,768], index: 2, kind: input, shape index: {}]   ;;  %s5466_s3 = inlined_call_operand.hbm [shape: bf16[384,384], index: 3, kind: input, shape index: {}]   ;;  %s5467_s4 = inlined_call_operand.vmem [shape: f32[1,384], index: 4, kind: input, shape index: {}]   ;;  %s5468_s5 = inlined_call_operand.hbm [shape: f32[2,8,384], index: 5, kind: output, shape index: {}]  }
   0x1   :  { %5476 = sst [smem:[#allocation19_spill]] %s5464_s1 }
   0x2   :  { %10 = vsyncpa [#allocation6], 0 }
   0x3   :  { %12 = vsyncpa [#allocation6 + $0x1], 0 }
   0x4   :  { %13 = vsyncpa [#allocation9], 0 }
   0x5   :  { %14 = vsyncpa [#allocation12], 0 }
   0x6   :  { %15 = vsyncpa [#allocation7], 0 }
   0x7   :  { %17 = vsyncpa [#allocation7 + $0x1], 0  ;;  %s5012_s18 = smov 0   ;;  %s5014_s19 = smov 0  }
   0x8   :  { %s5016_s20 = smov 0   ;;  %s5018_s21 = smov 0  }
   0x9   :  { %s5020_s22 = smov 0   ;;  %s5022_s23 = smov 0  }
   0xa LB: > { %s3652_s24 = sadd.s32 4294967295, %s4967_s23   ;;  %s3653_s25 = sadd.s32 4294967294, %s4967_s23   ;;  %s4967_s23 = sphi %s5022_s23, %s23_s23   ;;  %s4963_s22 = sphi %s5020_s22, %s5503_s22   ;;  %s4959_s21 = sphi %s5018_s21, %s5502_s21   ;;  %s4955_s20 = sphi %s5016_s20, %s5501_s20   ;;  %s4951_s19 = sphi %s5014_s19, %s5500_s19   ;;  %s4947_s18 = sphi %s5012_s18, %s5499_s18  }
   0xb   : > { %p55_p0 = scmp.ne.s32.totalorder %s4951_s19, %s4947_s18  ;;  %p5046_p1 = scmp.eq.s32.totalorder %s3652_s24, 0 }
   0xc   : > { %p5050_p2 = scmp.eq.s32.totalorder %s3652_s24, 1  ;;  %p171_p3 = scmp.eq.s32.totalorder %s3653_s25, 1 }
   0xd   : > { %s5477_s26 = scalar_select %p5046_p1, 1, 0 }
   0xe   : > { %s5478_s27 = scalar_select %p5050_p2, 1, 0 }
   0xf   : > { %p5056_p4 = por %p5046_p1, %p55_p0  ;;  %p3654_p5 = scmp.ge.s32.totalorder %s4967_s23, 1 }
  0x10   : > { %p5061_p6 = por %p171_p3, %p55_p0  ;;  %p178_p7 = scmp.lt.s32.totalorder %s4967_s23, 3 }
  0x11   : > { %s5479_s28 = scalar_select %p5056_p4, 1, 0 }
  0x12   : > { %s5480_s29 = scalar_select %p5061_p6, 1, 0 }
  0x13   : > { %p5066_p8 = pnand %p3654_p5, %p178_p7  ;;  %s4969_s6 = smov [#allocation8]  }
  0x14   : > { %5481 = sst [smem:[#allocation18_spill]] %s5480_s29  ;;  %s190_s7 = sshll.u32 %s4969_s6, 4  ;;  %s5070_s7 = int_to_ptr.vmem [resolvable:$true] %s190_s7 }
  0x15   : > { %s5482_s30 = scalar_select %p5066_p8, 1, 0 }
  0x16   : > { %p4233_p9 = pneg %p5066_p8  ;;  %s4970_s9 = smov [#allocation10]  }
  0x17   : > { %s203_s10 = sshll.u32 %s4970_s9, 4  ;;  %s5484_s1 = sld [smem:[#allocation19_spill]]  ;;  %s5081_s10 = int_to_ptr.vmem [resolvable:$true] %s203_s10 }
  0x18   : > { %p5077_p11 = pnand %p4233_p9, %p5046_p1 }
  0x1a   : > { %p5091_p13 = pneg %p5077_p11 }
  0x1d   : > { %s4763_s13 = scalar_lea.hbm %s5484_s1, 9216 }
  0x1e   : > { %p4764_p12 = scmp.ne.s32.totalorder %s5484_s1, %s4763_s13  ;;  %p4770_p5 = scmp.lt.u32.totalorder %s4763_s13, %s5484_s1 }
  0x20   : > { %p4766_p0 = pnand %p5091_p13, %p4764_p12 }
  0x22   : > { %p4767_p3 = pneg %p4766_p0 }
  0x24   : > { %p4772_p7 = pnand %p4770_p5, %p4767_p3 }
  0x26   : > { %4775 = shalt.err (!%p4772_p7)
}
  0x27   : > { %s4776_s25 = scalar_lea.vmem %s5070_s7, 9216  ;;  %p4784_p1 = scmp.lt.s32.totalorder %s5070_s7, %s5070_s7 }
  0x28   : > { %p4777_p9 = scmp.ne.s32.totalorder %s5070_s7, %s4776_s25  ;;  %p4785_p4 = scmp.lt.s32.totalorder %s4776_s25, %s4776_s25 }
  0x2a   : > { %p4779_p10 = pnand %p4777_p9, %p5091_p13  ;;  %p4786_p12 = por %p4785_p4, %p4784_p1 }
  0x2c   : > { %p4780_p6 = pneg %p4779_p10 }
  0x2e   : > { %p4787_p0 = pnand %p4786_p12, %p4780_p6 }
  0x30   : > { %4790 = shalt.err (!%p4787_p0)
}
  0x31   : > { %s5473_s6 = smov 192   ;;  %s5474_s9 = smov 12  }
  0x32   : > { %4236 = dma.hbm_to_vmem [thread:$0]  (!%p5077_p11), %s5484_s1, 9216, %s5070_s7, [#allocation9], %s5473_s6, %s5473_s6, %s5474_s9  }
  0x33   : > { %s4791_s15 = scalar_lea.hbm %s5465_s2, 18432 }
  0x34   : > { %p4792_p1 = scmp.ne.s32.totalorder %s5465_s2, %s4791_s15  ;;  %p4798_p10 = scmp.lt.u32.totalorder %s4791_s15, %s5465_s2 }
  0x36   : > { %p4794_p4 = pnand %p4792_p1, %p5091_p13 }
  0x38   : > { %p4795_p6 = pneg %p4794_p4 }
  0x3a   : > { %p4800_p3 = pnand %p4798_p10, %p4795_p6 }
  0x3c   : > { %4803 = shalt.err (!%p4800_p3)
}
  0x3d   : > { %s4804_s7 = scalar_lea.vmem %s5081_s10, 18432  ;;  %p4812_p12 = scmp.lt.s32.totalorder %s5081_s10, %s5081_s10 }
  0x3e   : > { %p4805_p5 = scmp.ne.s32.totalorder %s5081_s10, %s4804_s7  ;;  %p4813_p0 = scmp.lt.s32.totalorder %s4804_s7, %s4804_s7 }
  0x40   : > { %p4807_p7 = pnand %p4805_p5, %p5091_p13  ;;  %p4814_p1 = por %p4813_p0, %p4812_p12 }
  0x42   : > { %p4808_p9 = pneg %p4807_p7 }
  0x44   : > { %p4815_p4 = pnand %p4814_p1, %p4808_p9 }
  0x46   : > { %4818 = shalt.err (!%p4815_p4)
}
  0x47   : > { %s4973_s11 = smov 384   ;;  %s4974_s29 = smov 24  }
  0x48   : > { %4239 = dma.hbm_to_vmem [thread:$0]  (!%p5077_p11), %s5465_s2, 18432, %s5081_s10, [#allocation9], %s4973_s11, %s4973_s11, %s4974_s29  }
  0x49   : > { %s4975_s14 = smov [#allocation11]   ;;  %s4819_s25 = scalar_lea.hbm %s5466_s3, 9216 }
  0x4a   : > { %s216_s15 = sshll.u32 %s4975_s14, 4  ;;  %p4820_p6 = scmp.ne.s32.totalorder %s5466_s3, %s4819_s25  ;;  %s217_s15 = int_to_ptr.vmem [resolvable:$true] %s216_s15 }
  0x4b   : > { %p4826_p5 = scmp.lt.u32.totalorder %s4819_s25, %s5466_s3 }
  0x4c   : > { %p4822_p10 = pnand %p4820_p6, %p5091_p13 }
  0x4e   : > { %p4823_p3 = pneg %p4822_p10 }
  0x50   : > { %p4828_p7 = pnand %p4826_p5, %p4823_p3 }
  0x52   : > { %4831 = shalt.err (!%p4828_p7)
}
  0x53   : > { %s4832_s10 = scalar_lea.vmem %s217_s15, 9216  ;;  %p4840_p1 = scmp.lt.s32.totalorder %s217_s15, %s217_s15 }
  0x54   : > { %p4833_p9 = scmp.ne.s32.totalorder %s217_s15, %s4832_s10  ;;  %p4841_p4 = scmp.lt.s32.totalorder %s4832_s10, %s4832_s10 }
  0x56   : > { %p4835_p12 = pnand %p4833_p9, %p5091_p13  ;;  %p4842_p8 = por %p4841_p4, %p4840_p1 }
  0x58   : > { %p4836_p0 = pneg %p4835_p12 }
  0x5a   : > { %p4843_p2 = pnand %p4842_p8, %p4836_p0 }
  0x5c   : > { %4846 = shalt.err (!%p4843_p2)
}
  0x5d   : > { %s5486_s6 = smov 12   ;;  %s5487_s11 = smov 192  }
  0x5e   : > { %4242 = dma.hbm_to_vmem [thread:$0]  (!%p5077_p11), %s5466_s3, 9216, %s217_s15, [#allocation12], %s5487_s11, %s5487_s11, %s5486_s6  }
  0x5f   : > { %s35_s16 = sadd.s32 1, %s4963_s22  ;;  %s42_s8 = sadd.s32 1, %s4955_s20 }
  0x60   : > { %p37_p2 = scmp.ge.s32.totalorder %s35_s16, 2  ;;  %p49_p8 = scmp.ne.s32.totalorder %s4955_s20, %s4951_s19 }
  0x61   : > { %p50_p13 = scmp.eq.s32.totalorder %s4967_s23, 0  ;;  %p5488_p10 = scmp.ne.s32.totalorder %s5478_s27, 0 }
  0x62   : > { %s5505_s16 = smov (%p37_p2, %s35_s16), 0  ;;  %p4254_p5 = scmp.lt.s32.totalorder %s4967_s23, 2 }
  0x63   : > { %p51_p6 = por %p50_p13, %p49_p8  ;;  %p5168_p3 = por %p5488_p10, %p49_p8 }
  0x64   : > { %s39_s12 = ssub.s32 %s4963_s22, %s5505_s16  ;;  %s233_s13 = sand.u32 1, %s4955_s20  }
  0x65   : > { %p40_p7 = scmp.eq.s32.totalorder %s39_s12, 0  ;;  %s4212_s14 = smul.u32 12, %s233_s13 }
  0x66   : > { %s4213_s17 = smul.u32 192, %s4963_s22  ;;  %p5180_p11 = pnand %p4254_p5, %p51_p6 }
  0x67   : > { %s5177_s15 = scalar_select %p40_p7, %s4955_s20, %s42_s8  }
  0x68   : > { %s237_s24 = scalar_lea.vmem [#allocation5], %s4212_s14  ;;  %s5187_s6 = scalar_lea.hbm %s5463_s0, %s4213_s17 }
  0x69   : > { %s245_s25 = sshll.u32 %s237_s24, 4  ;;  %s234_s11 = scalar_lea.sflag [#allocation6], %s233_s13  ;;  %s5189_s25 = int_to_ptr.vmem [resolvable:$true] %s245_s25 }
  0x6a   : > { %s4847_s1 = scalar_lea.hbm %s5187_s6, 192  ;;  %p4849_p12 = pneg %p5180_p11 }
  0x6b   : > { %p4848_p9 = scmp.ne.s32.totalorder %s5187_s6, %s4847_s1  ;;  %s4852_s12 = scalar_lea.hbm %s5463_s0, 384 }
  0x6c   : > { %p4853_p4 = scmp.lt.u32.totalorder %s5187_s6, %s5463_s0  ;;  %p4854_p2 = scmp.lt.u32.totalorder %s4852_s12, %s4847_s1 }
  0x6d   : > { %p4850_p0 = pnand %p4849_p12, %p4848_p9  ;;  %p4856_p13 = scmp.lt.u32.totalorder %s4847_s1, %s5187_s6 }
  0x6e   : > { %p4855_p8 = por %p4854_p2, %p4853_p4 }
  0x6f   : > { %p4851_p1 = pneg %p4850_p0 }
  0x70   : > { %p4857_p6 = por %p4856_p13, %p4855_p8 }
  0x72   : > { %p4858_p10 = pnand %p4857_p6, %p4851_p1 }
  0x74   : > { %4861 = shalt.err (!%p4858_p10)
}
  0x75   : > { %s4862_s13 = scalar_lea.vmem %s5189_s25, 192  ;;  %s4976_s24 = smov [#allocation5]  }
  0x76   : > { %p4863_p5 = scmp.ne.s32.totalorder %s5189_s25, %s4862_s13  ;;  %s4867_s10 = sshll.u32 %s4976_s24, 4  ;;  %s4868_s10 = int_to_ptr.vmem [resolvable:$false] %s4867_s10 }
  0x77   : > { %s4869_s27 = scalar_lea.vmem %s4868_s10, 384  ;;  %p4870_p0 = scmp.lt.s32.totalorder %s5189_s25, %s4868_s10 }
  0x78   : > { %p4865_p7 = pnand %p4863_p5, %p4849_p12  ;;  %p4871_p4 = scmp.lt.s32.totalorder %s4869_s27, %s4862_s13 }
  0x7a   : > { %p4866_p9 = pneg %p4865_p7  ;;  %p4872_p2 = por %p4871_p4, %p4870_p0 }
  0x7c   : > { %p4873_p8 = pnand %p4872_p2, %p4866_p9 }
  0x7e   : > { %4876 = shalt.err (!%p4873_p8)
}
  0x7f   : > { %4246 = dma.hbm_to_vmem [thread:$0]  (!%p5180_p11), %s5187_s6, 192, %s5189_s25, %s234_s11  }
  0x80   : > { %p5491_p1 = scmp.ne.s32.totalorder %s5482_s30, 0 }
  0x81   : > { %s5219_s1 = sand.u32 (!%p5491_p1), 1, %s4951_s19   ;;  %p5492_p12 = scmp.ne.s32.totalorder (!%p5491_p1), %s5479_s28, 0 }
  0x82   : > { %254 = sbr.rel (%p5491_p1) target bundleno = 2245 (0x8c5), region = 40  ;;  %s257_s8 = scalar_lea.sflag (!%p5491_p1), [#allocation6], %s5219_s1 }
  0x83   : > { %s4214_s9 = smul.u32 (!%p5491_p1), 12, %s5219_s1 }
  0x85   : > { %s5223_s12 = scalar_lea.vmem (!%p5491_p1), [#allocation5], %s4214_s9 }
  0x89   : > { %4930 = dma.done.wait (%p5492_p12), %s257_s8, 192  }
  0x8a   : > { %4932 = vsyncadd (%p5492_p12), %s257_s8, 4294967104  ;;  %p5493_p11 = scmp.ne.s32.totalorder %s5477_s26, 0 }
  0x8c   : > { %4934 = dma.done.wait (%p5493_p11), [#allocation9], 27648  }
  0x8d   : > { %4936 = vsyncadd (%p5493_p11), [#allocation9], 4294939648 }
  0x8e   : > { %4938 = dma.done.wait (%p5493_p11), [#allocation12], 9216  }
  0x8f   : > { %4940 = vsyncadd (%p5493_p11), [#allocation12], 4294958080  ;;  %v4318_v0 = vld [vmem:[#allocation10 + $0xc] ss:$24 sps:$4 sm:$0xff]   ;;  %v4320_v1 = vld [vmem:[#allocation10 + $0x8] ss:$24 sps:$4 sm:$0xff]  }
  0x90   : > { %1264 = vmatprep.subr.bf16.mxu1 %v4318_v0  ;;  %v4321_v2 = vld [vmem:[#allocation10 + $0x3c] ss:$24 sps:$4 sm:$0xff]   ;;  %v4323_v3 = vld [vmem:[#allocation10 + $0x38] ss:$24 sps:$4 sm:$0xff]   ;;  %v4324_v4 = vld [vmem:[#allocation10 + $0x6c] ss:$24 sps:$4 sm:$0xff]  }
  0x91   : > { %1265 = vmatpush1.bf16.msra.mxu1 %v4320_v1  ;;  %v4326_v5 = vld [vmem:[#allocation10 + $0x68] ss:$24 sps:$4 sm:$0xff]   ;;  %v4327_v6 = vld [vmem:[#allocation10 + $0x9c] ss:$24 sps:$4 sm:$0xff]   ;;  %v4329_v7 = vld [vmem:[#allocation10 + $0x98] ss:$24 sps:$4 sm:$0xff]  }
  0x92   : > { %1266 = vmatprep.subr.bf16.mxu1 %v4321_v2  ;;  %v4330_v8 = vld [vmem:[#allocation10 + $0xcc] ss:$24 sps:$4 sm:$0xff]   ;;  %v4332_v9 = vld [vmem:[#allocation10 + $0xc8] ss:$24 sps:$4 sm:$0xff]   ;;  %v4333_v10 = vld [vmem:[#allocation10 + $0xfc] ss:$24 sps:$4 sm:$0xff]  }
  0x93   : > { %v4335_v11 = vld [vmem:[#allocation10 + $0xf8] ss:$24 sps:$4 sm:$0xff]   ;;  %v4360_v12 = vld [vmem:[#allocation10 + $0x4] ss:$24 sps:$4 sm:$0xff]   ;;  %v4366_v15 = vld [vmem:[#allocation10 + $0x34] ss:$24 sps:$4 sm:$0xff]  }
  0x94   : > { %v4362_v13 = vld [vmem:[#allocation10] ss:$24 sps:$4 sm:$0xff]   ;;  %v4336_v14 = vld [vmem:[#allocation10 + $0x12c] ss:$24 sps:$4 sm:$0xff]   ;;  %1182 = vmatprep.subr.bf16.mxu0 %v4360_v12  ;;  %v4368_v16 = vld [vmem:[#allocation10 + $0x30] ss:$24 sps:$4 sm:$0xff]  }
  0x95   : > { %1267 = vmatpush1.bf16.msra.mxu1 %v4323_v3  ;;  %1183 = vmatpush1.bf16.msra.mxu0 %v4362_v13  ;;  %v4338_v17 = vld [vmem:[#allocation10 + $0x128] ss:$24 sps:$4 sm:$0xff]   ;;  %v4339_v18 = vld [vmem:[#allocation10 + $0x15c] ss:$24 sps:$4 sm:$0xff]   ;;  %v4341_v21 = vld [vmem:[#allocation10 + $0x158] ss:$24 sps:$4 sm:$0xff]  }
  0x96   : > { %1268 = vmatprep.subr.bf16.mxu1 %v4324_v4  ;;  %1184 = vmatprep.subr.bf16.mxu0 %v4366_v15  ;;  %v4372_v19 = vld [vmem:[#allocation10 + $0x64] ss:$24 sps:$4 sm:$0xff]   ;;  %v5238_v20 = vld [vmem:[%s5223_s12] sm:$0xff]  ;;  %v4977_v1 = vmov 0   ;;  %vm4979_vm0 = vmmov 0   ;;  %vm2143_vm1 = vcmask 523264  }
  0x97   : > { %v4374_v22 = vld [vmem:[#allocation10 + $0x60] ss:$24 sps:$4 sm:$0xff]   ;;  %v5242_v23 = vcombine.high %v5238_v20, %v5238_v20  ;;  %v4380_v24 = vld [vmem:[#allocation10 + $0x94] ss:$24 sps:$4 sm:$0xff]   ;;  %v4382_v27 = vld [vmem:[#allocation10 + $0x90] ss:$24 sps:$4 sm:$0xff]   ;;  %v5248_v58 = vcombine.low %v5238_v20, %v5238_v20 }
  0x98   : > { %v4342_v25 = vld [vmem:[#allocation10 + $0x18c] ss:$24 sps:$4 sm:$0xff]   ;;  %v4344_v26 = vld [vmem:[#allocation10 + $0x188] ss:$24 sps:$4 sm:$0xff]   ;;  %v4345_v29 = vld [vmem:[#allocation10 + $0x1bc] ss:$24 sps:$4 sm:$0xff]  }
  0x99   : > { %1269 = vmatpush1.bf16.msra.mxu1 %v4326_v5  ;;  %1185 = vmatpush1.bf16.msra.mxu0 %v4368_v16  ;;  %v4386_v28 = vld [vmem:[#allocation10 + $0xc4] ss:$24 sps:$4 sm:$0xff]   ;;  %v4347_v30 = vld [vmem:[#allocation10 + $0x1b8] ss:$24 sps:$4 sm:$0xff]   ;;  %v4392_v32 = vld [vmem:[#allocation10 + $0xf4] ss:$24 sps:$4 sm:$0xff]  }
  0x9a   : > { %1270 = vmatprep.subr.bf16.mxu1 %v4327_v6  ;;  %1186 = vmatprep.subr.bf16.mxu0 %v4372_v19  ;;  %v4388_v31 = vld [vmem:[#allocation10 + $0xc0] ss:$24 sps:$4 sm:$0xff]   ;;  %v4348_v33 = vld [vmem:[#allocation10 + $0x1ec] ss:$24 sps:$4 sm:$0xff]   ;;  %v4394_v35 = vld [vmem:[#allocation10 + $0xf0] ss:$24 sps:$4 sm:$0xff]  }
  0x9b   : > { %1296 = vmatprep.mubr.bf16.mxu1 %v5242_v23  ;;  %1214 = vmatprep.mubr.bf16.mxu0 %v5242_v23  ;;  %v4350_v34 = vld [vmem:[#allocation10 + $0x1e8] ss:$24 sps:$4 sm:$0xff]   ;;  %v4398_v36 = vld [vmem:[#allocation10 + $0x124] ss:$24 sps:$4 sm:$0xff]   ;;  %v4353_v38 = vld [vmem:[#allocation10 + $0x218] ss:$24 sps:$4 sm:$0xff]  }
  0x9c   : > { %v4351_v37 = vld [vmem:[#allocation10 + $0x21c] ss:$24 sps:$4 sm:$0xff]   ;;  %v4400_v39 = vld [vmem:[#allocation10 + $0x120] ss:$24 sps:$4 sm:$0xff]   ;;  %v4354_v41 = vld [vmem:[#allocation10 + $0x24c] ss:$24 sps:$4 sm:$0xff]  }
  0x9d   : > { %1271 = vmatpush1.bf16.msra.mxu1 %v4329_v7  ;;  %1187 = vmatpush1.bf16.msra.mxu0 %v4374_v22  ;;  %v4404_v40 = vld [vmem:[#allocation10 + $0x154] ss:$24 sps:$4 sm:$0xff]   ;;  %v4356_v42 = vld [vmem:[#allocation10 + $0x248] ss:$24 sps:$4 sm:$0xff]   ;;  %v4410_v44 = vld [vmem:[#allocation10 + $0x184] ss:$24 sps:$4 sm:$0xff]  }
  0x9e   : > { %1272 = vmatprep.subr.bf16.mxu1 %v4330_v8  ;;  %1188 = vmatprep.subr.bf16.mxu0 %v4380_v24  ;;  %v4406_v43 = vld [vmem:[#allocation10 + $0x150] ss:$24 sps:$4 sm:$0xff]   ;;  %v4357_v45 = vld [vmem:[#allocation10 + $0x27c] ss:$24 sps:$4 sm:$0xff]   ;;  %v4412_v46 = vld [vmem:[#allocation10 + $0x180] ss:$24 sps:$4 sm:$0xff]  }
  0x9f   : > { %v4359_v47 = vld [vmem:[#allocation10 + $0x278] ss:$24 sps:$4 sm:$0xff]   ;;  %v4416_v48 = vld [vmem:[#allocation10 + $0x1b4] ss:$24 sps:$4 sm:$0xff]   ;;  %v4365_v51 = vld [vmem:[#allocation10 + $0x2a8] ss:$24 sps:$4 sm:$0xff]  }
  0xa0   : > { %v4363_v49 = vld [vmem:[#allocation10 + $0x2ac] ss:$24 sps:$4 sm:$0xff]   ;;  %v4418_v50 = vld [vmem:[#allocation10 + $0x1b0] ss:$24 sps:$4 sm:$0xff]   ;;  %v4369_v53 = vld [vmem:[#allocation10 + $0x2dc] ss:$24 sps:$4 sm:$0xff]  }
  0xa1   : > { %1273 = vmatpush1.bf16.msra.mxu1 %v4332_v9  ;;  %1189 = vmatpush1.bf16.msra.mxu0 %v4382_v27  ;;  %v4422_v52 = vld [vmem:[#allocation10 + $0x1e4] ss:$24 sps:$4 sm:$0xff]   ;;  %v4424_v54 = vld [vmem:[#allocation10 + $0x1e0] ss:$24 sps:$4 sm:$0xff]   ;;  %v4429_v56 = vld [vmem:[#allocation10 + $0x214] ss:$24 sps:$4 sm:$0xff]  }
  0xa2   : > { %1274 = vmatprep.subr.bf16.mxu1 %v4333_v10  ;;  %1190 = vmatprep.subr.bf16.mxu0 %v4386_v28  ;;  %v4371_v55 = vld [vmem:[#allocation10 + $0x2d8] ss:$24 sps:$4 sm:$0xff]   ;;  %v4378_v57 = vld [vmem:[#allocation10 + $0x30c] ss:$24 sps:$4 sm:$0xff]   ;;  %v4376_v60 = vld [vmem:[#allocation10 + $0x308] ss:$24 sps:$4 sm:$0xff]  }
  0xa3   : > { %v4431_v59 = vld [vmem:[#allocation10 + $0x210] ss:$24 sps:$4 sm:$0xff]   ;;  %v4385_v61 = vld [vmem:[#allocation10 + $0x33c] ss:$24 sps:$4 sm:$0xff]   ;;  %v4437_v63 = vld [vmem:[#allocation10 + $0x240] ss:$24 sps:$4 sm:$0xff]  }
  0xa4   : > { %v4435_v62 = vld [vmem:[#allocation10 + $0x244] ss:$24 sps:$4 sm:$0xff]   ;;  %v4383_v0 = vld [vmem:[#allocation10 + $0x338] ss:$24 sps:$4 sm:$0xff]   ;;  %v4441_v2 = vld [vmem:[#allocation10 + $0x274] ss:$24 sps:$4 sm:$0xff]  }
  0xa5   : > { %1275 = vmatpush1.bf16.msra.mxu1 %v4335_v11  ;;  %1191 = vmatpush1.bf16.msra.mxu0 %v4388_v31  ;;  %v4391_v3 = vld [vmem:[#allocation10 + $0x36c] ss:$24 sps:$4 sm:$0xff]   ;;  %v4443_v4 = vld [vmem:[#allocation10 + $0x270] ss:$24 sps:$4 sm:$0xff]   ;;  %v4397_v7 = vld [vmem:[#allocation10 + $0x39c] ss:$24 sps:$4 sm:$0xff]  }
  0xa6   : > { %1276 = vmatprep.subr.bf16.mxu1 %v4336_v14  ;;  %1192 = vmatprep.subr.bf16.mxu0 %v4392_v32  ;;  %v4389_v5 = vld [vmem:[#allocation10 + $0x368] ss:$24 sps:$4 sm:$0xff]   ;;  %v4447_v6 = vld [vmem:[#allocation10 + $0x2a4] ss:$24 sps:$4 sm:$0xff]   ;;  %v4395_v9 = vld [vmem:[#allocation10 + $0x398] ss:$24 sps:$4 sm:$0xff]  }
  0xa7   : > { %v4449_v8 = vld [vmem:[#allocation10 + $0x2a0] ss:$24 sps:$4 sm:$0xff]   ;;  %v4453_v10 = vld [vmem:[#allocation10 + $0x2d4] ss:$24 sps:$4 sm:$0xff]   ;;  %v4455_v12 = vld [vmem:[#allocation10 + $0x2d0] ss:$24 sps:$4 sm:$0xff]  }
  0xa8   : > { %v4403_v11 = vld [vmem:[#allocation10 + $0x3cc] ss:$24 sps:$4 sm:$0xff]   ;;  %v4401_v13 = vld [vmem:[#allocation10 + $0x3c8] ss:$24 sps:$4 sm:$0xff]   ;;  %v4409_v15 = vld [vmem:[#allocation10 + $0x3fc] ss:$24 sps:$4 sm:$0xff]  }
  0xa9   : > { %1277 = vmatpush1.bf16.msra.mxu1 %v4338_v17  ;;  %1193 = vmatpush1.bf16.msra.mxu0 %v4394_v35  ;;  %v4461_v14 = vld [vmem:[#allocation10 + $0x304] ss:$24 sps:$4 sm:$0xff]   ;;  %v4459_v16 = vld [vmem:[#allocation10 + $0x300] ss:$24 sps:$4 sm:$0xff]   ;;  %v4465_v20 = vld [vmem:[#allocation10 + $0x330] ss:$24 sps:$4 sm:$0xff]  }
  0xaa   : > { %1278 = vmatprep.subr.bf16.mxu1 %v4339_v18  ;;  %1194 = vmatprep.subr.bf16.mxu0 %v4398_v36  ;;  %v4407_v17 = vld [vmem:[#allocation10 + $0x3f8] ss:$24 sps:$4 sm:$0xff]   ;;  %v4467_v18 = vld [vmem:[#allocation10 + $0x334] ss:$24 sps:$4 sm:$0xff]   ;;  %v4473_v22 = vld [vmem:[#allocation10 + $0x364] ss:$24 sps:$4 sm:$0xff]  }
  0xab   : > { %v4415_v19 = vld [vmem:[#allocation10 + $0x42c] ss:$24 sps:$4 sm:$0xff]   ;;  %v4421_v24 = vld [vmem:[#allocation10 + $0x45c] ss:$24 sps:$4 sm:$0xff]   ;;  %v4483_v35 = vld [vmem:[#allocation10 + $0x3c0] ss:$24 sps:$4 sm:$0xff]  }
  0xac   : > { %v4479_v27 = vld [vmem:[#allocation10 + $0x394] ss:$24 sps:$4 sm:$0xff]   ;;  %v4428_v28 = vld [vmem:[#allocation8 + $0x4] ss:$12 sps:$4 sm:$0xff]   ;;  %s4980_s26 = smov 64   ;;  %vm2207_vm2 = vcmask 1043456  }
  0xad   : > { %1279 = vmatpush1.bf16.msra.mxu1 %v4341_v21  ;;  %1195 = vmatpush1.bf16.msra.mxu0 %v4400_v39  ;;  %v4413_v21 = vld [vmem:[#allocation10 + $0x428] ss:$24 sps:$4 sm:$0xff]   ;;  %v4485_v32 = vld [vmem:[#allocation10 + $0x3c4] ss:$24 sps:$4 sm:$0xff]   ;;  %v4491_v36 = vld [vmem:[#allocation10 + $0x3f4] ss:$24 sps:$4 sm:$0xff]  }
  0xae   : > { %1280 = vmatprep.subr.bf16.mxu1 %v4342_v25  ;;  %1196 = vmatprep.subr.bf16.mxu0 %v4404_v40  ;;  %v4471_v25 = vld [vmem:[#allocation10 + $0x360] ss:$24 sps:$4 sm:$0xff]   ;;  %v4489_v39 = vld [vmem:[#allocation10 + $0x3f0] ss:$24 sps:$4 sm:$0xff]   ;;  %v4497_v40 = vld [vmem:[#allocation10 + $0x424] ss:$24 sps:$4 sm:$0xff]  }
  0xaf   : > { %v4426_v31 = vld [vmem:[#allocation8] ss:$12 sps:$4 sm:$0xff]   ;;  %vm2191_vm4 = vcmask 64512   ;;  %vm2379_vm5 = vcmask 1048064   ;;  %s4215_s28 = smul.u32 24, %s5219_s1  ;;  %s4981_s10 = smov [#allocation13]  }
  0xb0   : > { %s4216_s7 = smul.u32 384, %s4959_s21  ;;  %s3524_s21 = scalar_lea.sflag [#allocation7], %s5219_s1 }
  0xb1   : > { %1281 = vmatpush1.bf16.msra.mxu1 %v4344_v26  ;;  %1197 = vmatpush1.bf16.msra.mxu0 %v4406_v43  ;;  %v4419_v26 = vld [vmem:[#allocation10 + $0x458] ss:$24 sps:$4 sm:$0xff]   ;;  %s298_s6 = scalar_lea.vmem [#allocation13], %s4215_s28  ;;  %s4881_s27 = sshll.u32 %s4981_s10, 4  ;;  %s4882_s27 = int_to_ptr.vmem [resolvable:$false] %s4881_s27 }
  0xb2   : > { %1282 = vmatprep.subr.bf16.mxu1 %v4345_v29  ;;  %1198 = vmatprep.subr.bf16.mxu0 %v4410_v44  ;;  %v5255_v29 = vld [vmem:[%s5223_s12 + $0x8] ss:$0 sps:$4 sm:$0xff]   ;;  %v4495_v43 = vld [vmem:[#allocation10 + $0x420] ss:$24 sps:$4 sm:$0xff]   ;;  %v4503_v44 = vld [vmem:[#allocation10 + $0x454] ss:$24 sps:$4 sm:$0xff]   ;;  %s5414_s13 = scalar_lea.hbm %s5468_s5, %s4216_s7 }
  0xb3   : > { %s3540_s11 = sshll.u32 %s298_s6, 4  ;;  %s4883_s9 = scalar_lea.vmem %s4882_s27, 768  ;;  %s5416_s11 = int_to_ptr.vmem [resolvable:$true] %s3540_s11 }
  0xb4   : > { %s4877_s24 = scalar_lea.vmem %s5416_s11, 384  ;;  %p4884_p5 = scmp.lt.s32.totalorder %s5416_s11, %s4882_s27 }
  0xb5   : > { %1283 = vmatpush1.bf16.msra.mxu1 %v4347_v30  ;;  %1199 = vmatpush1.bf16.msra.mxu0 %v4412_v46  ;;  %v4477_v30 = vld [vmem:[#allocation10 + $0x390] ss:$24 sps:$4 sm:$0xff]   ;;  %v4450_v46 = vld [vmem:[#allocation8 + $0x60] ss:$12 sps:$4 sm:$0xff]   ;;  %p4878_p13 = scmp.ne.s32.totalorder %s5416_s11, %s4877_s24  ;;  %p4885_p7 = scmp.lt.s32.totalorder %s4883_s9, %s4877_s24 }
  0xb6   : > { %1284 = vmatprep.subr.bf16.mxu1 %v4348_v33  ;;  %1200 = vmatprep.subr.bf16.mxu0 %v4416_v48  ;;  %v4434_v33 = vld [vmem:[#allocation8 + $0x1c] ss:$12 sps:$4 sm:$0xff]   ;;  %v4540_v48 = vld [vmem:[#allocation10 + $0x14] ss:$24 sps:$4 sm:$0xff]  }
  0xb7   : > { %p4879_p6 = pnand %p4878_p13, %p5168_p3  ;;  %p4886_p9 = por %p4885_p7, %p4884_p5 }
  0xb9   : > { %1285 = vmatpush1.bf16.msra.mxu1 %v4350_v34  ;;  %1201 = vmatpush1.bf16.msra.mxu0 %v4418_v50  ;;  %v4432_v34 = vld [vmem:[#allocation8 + $0x18] ss:$12 sps:$4 sm:$0xff]   ;;  %p4880_p10 = pneg %p4879_p6 }
  0xba   : > { %1286 = vmatprep.subr.bf16.mxu1 %v4351_v37  ;;  %1202 = vmatprep.subr.bf16.mxu0 %v4422_v52  ;;  %v4440_v37 = vld [vmem:[#allocation8 + $0x34] ss:$12 sps:$4 sm:$0xff]   ;;  %v4456_v50 = vld [vmem:[#allocation8 + $0x78] ss:$12 sps:$4 sm:$0xff]  }
  0xbb   : > { %v4543_v52 = vld [vmem:[#allocation10 + $0x44] ss:$24 sps:$4 sm:$0xff]   ;;  %p4887_p0 = pnand %p4886_p9, %p4880_p10 }
  0xbd   : > { %1287 = vmatpush1.bf16.msra.mxu1 %v4353_v38  ;;  %1203 = vmatpush1.bf16.msra.mxu0 %v4424_v54  ;;  %v4438_v38 = vld [vmem:[#allocation8 + $0x30] ss:$12 sps:$4 sm:$0xff]  }
  0xbe   : > { %1288 = vmatprep.subr.bf16.mxu1 %v4354_v41  ;;  %1204 = vmatprep.subr.bf16.mxu0 %v4429_v56  ;;  %v4446_v41 = vld [vmem:[#allocation8 + $0x4c] ss:$12 sps:$4 sm:$0xff]   ;;  %v4462_v54 = vld [vmem:[#allocation8 + $0x90] ss:$12 sps:$4 sm:$0xff]  }
  0xbf   : > { %v4541_v56 = vld [vmem:[#allocation10 + $0x40] ss:$24 sps:$4 sm:$0xff]  }
  0xc1   : > { %1289 = vmatpush1.bf16.msra.mxu1 %v4356_v42  ;;  %1205 = vmatpush1.bf16.msra.mxu0 %v4431_v59  ;;  %v4444_v42 = vld [vmem:[#allocation8 + $0x48] ss:$12 sps:$4 sm:$0xff]  }
  0xc2   : > { %1290 = vmatprep.subr.bf16.mxu1 %v4357_v45  ;;  %1206 = vmatprep.subr.bf16.mxu0 %v4435_v62  ;;  %v4452_v45 = vld [vmem:[#allocation8 + $0x64] ss:$12 sps:$4 sm:$0xff]  }
  0xc3   : > { %v4544_v59 = vld [vmem:[#allocation10 + $0x70] ss:$24 sps:$4 sm:$0xff]  }
  0xc4   : > { %v4476_v62 = vld [vmem:[#allocation8 + $0xc4] ss:$12 sps:$4 sm:$0xff]  }
  0xc5   : > { %1291 = vmatpush1.bf16.msra.mxu1 %v4359_v47  ;;  %1207 = vmatpush1.bf16.msra.mxu0 %v4437_v63  ;;  %v4501_v47 = vld [vmem:[#allocation10 + $0x450] ss:$24 sps:$4 sm:$0xff]   ;;  %v4547_v63 = vld [vmem:[#allocation10 + $0xa0] ss:$24 sps:$4 sm:$0xff]  }
  0xc6   : > { %1292 = vmatprep.subr.bf16.mxu1 %v4363_v49  ;;  %1208 = vmatprep.subr.bf16.mxu0 %v4441_v2  ;;  %v4458_v49 = vld [vmem:[#allocation8 + $0x7c] ss:$12 sps:$4 sm:$0xff]   ;;  %v4552_v2 = vld [vmem:[#allocation10 + $0xd4] ss:$24 sps:$4 sm:$0xff]  }
  0xc9   : > { %1293 = vmatpush1.bf16.msra.mxu1 %v4365_v51  ;;  %1209 = vmatpush1.bf16.msra.mxu0 %v4443_v4  ;;  %v4538_v51 = vld [vmem:[#allocation10 + $0x10] ss:$24 sps:$4 sm:$0xff]  }
  0xca   : > { %1294 = vmatprep.subr.bf16.mxu1 %v4369_v53  ;;  %1210 = vmatprep.subr.bf16.mxu0 %v4447_v6  ;;  %v4464_v53 = vld [vmem:[#allocation8 + $0x94] ss:$12 sps:$4 sm:$0xff]   ;;  %v4550_v4 = vld [vmem:[#allocation10 + $0xd0] ss:$24 sps:$4 sm:$0xff]   ;;  %v4555_v6 = vld [vmem:[#allocation10 + $0x104] ss:$24 sps:$4 sm:$0xff]  }
  0xcd   : > { %1295 = vmatpush1.bf16.msra.mxu1 %v4371_v55  ;;  %1211 = vmatpush1.bf16.msra.mxu0 %v4449_v8  ;;  %v4470_v55 = vld [vmem:[#allocation8 + $0xac] ss:$12 sps:$4 sm:$0xff]  }
  0xce   : > { %1305 = vmatprep.subr.bf16.mxu1 %v4378_v57  ;;  %1212 = vmatprep.subr.bf16.mxu0 %v4453_v10  ;;  %v4546_v57 = vld [vmem:[#allocation10 + $0x74] ss:$24 sps:$4 sm:$0xff]   ;;  %v4553_v8 = vld [vmem:[#allocation10 + $0x100] ss:$24 sps:$4 sm:$0xff]  }
  0xcf   : > { %v4558_v10 = vld [vmem:[#allocation10 + $0x134] ss:$24 sps:$4 sm:$0xff]  }
  0xd0   : > { %1297 = vmatmul.mubr.bf16.vlgmr.msra.gmra.mrb[0].mxu1 %v5248_v58 }
  0xd1   : > { %1306 = vmatpush1.bf16.msra.mxu1 %v4376_v60  ;;  %1337 = vmatprep.mubr.bf16.mxu1 %v4977_v1  ;;  %v4468_v60 = vld [vmem:[#allocation8 + $0xa8] ss:$12 sps:$4 sm:$0xff]  }
  0xd2   : > { %1307 = vmatprep.subr.bf16.mxu1 %v4385_v61  ;;  %1213 = vmatpush1.bf16.msra.mxu0 %v4455_v12  ;;  %v4549_v61 = vld [vmem:[#allocation10 + $0xa4] ss:$24 sps:$4 sm:$0xff]   ;;  %v4556_v12 = vld [vmem:[#allocation10 + $0x130] ss:$24 sps:$4 sm:$0xff]  }
  0xd3   : > { %1223 = vmatprep.subr.bf16.mxu0 %v4461_v14  ;;  %v4561_v14 = vld [vmem:[#allocation10 + $0x164] ss:$24 sps:$4 sm:$0xff]  }
  0xd5   : > { %1308 = vmatpush1.bf16.msra.mxu1 %v4383_v0  ;;  %1215 = vmatmul.mubr.bf16.vlgmr.msra.gmra.mrb[0].mxu0 %v5248_v58  ;;  %v4474_v0 = vld [vmem:[#allocation8 + $0xc0] ss:$12 sps:$4 sm:$0xff]  }
  0xd6   : > { %1309 = vmatprep.subr.bf16.mxu1 %v4391_v3  ;;  %1224 = vmatpush1.bf16.msra.mxu0 %v4459_v16  ;;  %v4482_v3 = vld [vmem:[#allocation8 + $0xdc] ss:$12 sps:$4 sm:$0xff]   ;;  %v4559_v16 = vld [vmem:[#allocation10 + $0x160] ss:$24 sps:$4 sm:$0xff]  }
  0xd7   : > { %1255 = vmatprep.mubr.bf16.mxu0 %v4977_v1  ;;  %1225 = vmatprep.subr.bf16.mxu0 %v4467_v18  ;;  %v4564_v18 = vld [vmem:[#allocation10 + $0x194] ss:$24 sps:$4 sm:$0xff]  }
  0xd9   : > { %1310 = vmatpush1.bf16.msra.mxu1 %v4389_v5  ;;  %v4480_v5 = vld [vmem:[#allocation8 + $0xd8] ss:$12 sps:$4 sm:$0xff]  }
  0xda   : > { %1311 = vmatprep.subr.bf16.mxu1 %v4397_v7  ;;  %1226 = vmatpush1.bf16.msra.mxu0 %v4465_v20  ;;  %v4488_v7 = vld [vmem:[#allocation8 + $0xf4] ss:$12 sps:$4 sm:$0xff]   ;;  %v4562_v20 = vld [vmem:[#allocation10 + $0x190] ss:$24 sps:$4 sm:$0xff]  }
  0xdb   : > { %1227 = vmatprep.subr.bf16.mxu0 %v4473_v22  ;;  %v4567_v22 = vld [vmem:[#allocation10 + $0x1c4] ss:$24 sps:$4 sm:$0xff]  }
  0xdd   : > { %1312 = vmatpush1.bf16.msra.mxu1 %v4395_v9  ;;  %v4486_v9 = vld [vmem:[#allocation8 + $0xf0] ss:$12 sps:$4 sm:$0xff]  }
  0xde   : > { %1313 = vmatprep.subr.bf16.mxu1 %v4403_v11  ;;  %1228 = vmatpush1.bf16.msra.mxu0 %v4471_v25  ;;  %v4494_v11 = vld [vmem:[#allocation8 + $0x10c] ss:$12 sps:$4 sm:$0xff]  }
  0xdf   : > { %1229 = vmatprep.subr.bf16.mxu0 %v4479_v27  ;;  %v4565_v25 = vld [vmem:[#allocation10 + $0x1c0] ss:$24 sps:$4 sm:$0xff]   ;;  %v4570_v27 = vld [vmem:[#allocation10 + $0x1f4] ss:$24 sps:$4 sm:$0xff]  }
  0xe1   : > { %1314 = vmatpush1.bf16.msra.mxu1 %v4401_v13  ;;  %v4492_v13 = vld [vmem:[#allocation8 + $0x108] ss:$12 sps:$4 sm:$0xff]  }
  0xe2   : > { %1315 = vmatprep.subr.bf16.mxu1 %v4409_v15  ;;  %1230 = vmatpush1.bf16.msra.mxu0 %v4477_v30  ;;  %v4500_v15 = vld [vmem:[#allocation8 + $0x124] ss:$12 sps:$4 sm:$0xff]  }
  0xe3   : > { %1231 = vmatprep.subr.bf16.mxu0 %v4485_v32  ;;  %v4568_v30 = vld [vmem:[#allocation10 + $0x1f0] ss:$24 sps:$4 sm:$0xff]   ;;  %v4573_v32 = vld [vmem:[#allocation10 + $0x224] ss:$24 sps:$4 sm:$0xff]  }
  0xe5   : > { %1316 = vmatpush1.bf16.msra.mxu1 %v4407_v17  ;;  %v4498_v17 = vld [vmem:[#allocation8 + $0x120] ss:$12 sps:$4 sm:$0xff]  }
  0xe6   : > { %1317 = vmatprep.subr.bf16.mxu1 %v4415_v19  ;;  %1232 = vmatpush1.bf16.msra.mxu0 %v4483_v35  ;;  %v4506_v19 = vld [vmem:[#allocation8 + $0x13c] ss:$12 sps:$4 sm:$0xff]   ;;  %v4513_v35 = vld [vmem:[#allocation8 + $0x180] ss:$12 sps:$4 sm:$0xff]  }
  0xe7   : > { %1233 = vmatprep.subr.bf16.mxu0 %v4491_v36  ;;  %v4518_v36 = vld [vmem:[#allocation8 + $0x19c] ss:$12 sps:$4 sm:$0xff]  }
  0xe9   : > { %1318 = vmatpush1.bf16.msra.mxu1 %v4413_v21  ;;  %v4504_v21 = vld [vmem:[#allocation8 + $0x138] ss:$12 sps:$4 sm:$0xff]  }
  0xea   : > { %1319 = vmatprep.subr.bf16.mxu1 %v4421_v24  ;;  %1234 = vmatpush1.bf16.msra.mxu0 %v4489_v39  ;;  %v4509_v24 = vld [vmem:[#allocation8 + $0x154] ss:$12 sps:$4 sm:$0xff]   ;;  %v4516_v39 = vld [vmem:[#allocation8 + $0x198] ss:$12 sps:$4 sm:$0xff]  }
  0xeb   : > { %1235 = vmatprep.subr.bf16.mxu0 %v4497_v40  ;;  %v4579_v40 = vld [vmem:[#allocation10 + $0x284] ss:$24 sps:$4 sm:$0xff]  }
  0xed   : > { %1320 = vmatpush1.bf16.msra.mxu1 %v4419_v26  ;;  %v4507_v26 = vld [vmem:[#allocation8 + $0x150] ss:$12 sps:$4 sm:$0xff]  }
  0xee   : > { %1953 = vmatprep.subr.bf16.mxu1 %v4428_v28  ;;  %1236 = vmatpush1.bf16.msra.mxu0 %v4495_v43  ;;  %v4512_v28 = vld [vmem:[#allocation8 + $0x16c] ss:$12 sps:$4 sm:$0xff]   ;;  %v4519_v43 = vld [vmem:[#allocation8 + $0x1b0] ss:$12 sps:$4 sm:$0xff]  }
  0xef   : > { %1237 = vmatprep.subr.bf16.mxu0 %v4503_v44  ;;  %v4582_v44 = vld [vmem:[#allocation10 + $0x2b4] ss:$24 sps:$4 sm:$0xff]  }
  0xf0   : > { %1338 = vmatmul.mubr.bf16.vlgmr.msra.gmra.mrb[0].mxu1 %v5255_v29 }
  0xf1   : > { %1954 = vmatpush1.bf16.msra.mxu1 %v4426_v31  ;;  %1985 = vmatprep.mubr.bf16.mxu1 %v5242_v23  ;;  %v4510_v31 = vld [vmem:[#allocation8 + $0x168] ss:$12 sps:$4 sm:$0xff]  }
  0xf2   : > { %1955 = vmatprep.subr.bf16.mxu1 %v4434_v33  ;;  %1238 = vmatpush1.bf16.msra.mxu0 %v4501_v47  ;;  %v4515_v33 = vld [vmem:[#allocation8 + $0x184] ss:$12 sps:$4 sm:$0xff]   ;;  %v4522_v47 = vld [vmem:[#allocation8 + $0x1c8] ss:$12 sps:$4 sm:$0xff]  }
  0xf3   : > { %1346 = vmatprep.subr.bf16.mxu0 %v4540_v48  ;;  %v4585_v48 = vld [vmem:[#allocation10 + $0x2e4] ss:$24 sps:$4 sm:$0xff]  }
  0xf5   : > { %1956 = vmatpush1.bf16.msra.mxu1 %v4432_v34  ;;  %1256 = vmatmul.mubr.bf16.vlgmr.msra.gmra.mrb[0].mxu0 %v5255_v29  ;;  %v4571_v34 = vld [vmem:[#allocation10 + $0x220] ss:$24 sps:$4 sm:$0xff]  }
  0xf6   : > { %1957 = vmatprep.subr.bf16.mxu1 %v4440_v37  ;;  %1347 = vmatpush1.bf16.msra.mxu0 %v4538_v51  ;;  %v4576_v37 = vld [vmem:[#allocation10 + $0x254] ss:$24 sps:$4 sm:$0xff]  }
  0xf7   : > { %1378 = vmatprep.mubr.bf16.mxu0 %v5242_v23  ;;  %1348 = vmatprep.subr.bf16.mxu0 %v4543_v52  ;;  %v4525_v51 = vld [vmem:[#allocation8 + $0x1e0] ss:$12 sps:$4 sm:$0xff]   ;;  %v4530_v52 = vld [vmem:[#allocation8 + $0x1fc] ss:$12 sps:$4 sm:$0xff]  }
  0xf9   : > { %1958 = vmatpush1.bf16.msra.mxu1 %v4438_v38  ;;  %v4574_v38 = vld [vmem:[#allocation10 + $0x250] ss:$24 sps:$4 sm:$0xff]  }
  0xfa   : > { %1959 = vmatprep.subr.bf16.mxu1 %v4446_v41  ;;  %1349 = vmatpush1.bf16.msra.mxu0 %v4541_v56  ;;  %v4521_v41 = vld [vmem:[#allocation8 + $0x1b4] ss:$12 sps:$4 sm:$0xff]   ;;  %v4586_v56 = vld [vmem:[#allocation10 + $0x310] ss:$24 sps:$4 sm:$0xff]  }
  0xfb   : > { %1350 = vmatprep.subr.bf16.mxu0 %v4546_v57  ;;  %v4531_v57 = vld [vmem:[#allocation8 + $0x210] ss:$12 sps:$4 sm:$0xff]  }
  0xfd   : > { %1960 = vmatpush1.bf16.msra.mxu1 %v4444_v42  ;;  %v4577_v42 = vld [vmem:[#allocation10 + $0x280] ss:$24 sps:$4 sm:$0xff]  }
  0xfe   : > { %1961 = vmatprep.subr.bf16.mxu1 %v4452_v45  ;;  %1351 = vmatpush1.bf16.msra.mxu0 %v4544_v59  ;;  %v4524_v45 = vld [vmem:[#allocation8 + $0x1cc] ss:$12 sps:$4 sm:$0xff]  }
  0xff   : > { %1352 = vmatprep.subr.bf16.mxu0 %v4549_v61  ;;  %v4536_v59 = vld [vmem:[#allocation8 + $0x22c] ss:$12 sps:$4 sm:$0xff]  }
 0x100   : > { %v4589_v61 = vld [vmem:[#allocation10 + $0x340] ss:$24 sps:$4 sm:$0xff]  }
 0x101   : > { %1962 = vmatpush1.bf16.msra.mxu1 %v4450_v46  ;;  %v4580_v46 = vld [vmem:[#allocation10 + $0x2b0] ss:$24 sps:$4 sm:$0xff]  }
 0x102   : > { %1963 = vmatprep.subr.bf16.mxu1 %v4458_v49  ;;  %1353 = vmatpush1.bf16.msra.mxu0 %v4547_v63  ;;  %v4527_v49 = vld [vmem:[#allocation8 + $0x1e4] ss:$12 sps:$4 sm:$0xff]   ;;  %v4534_v63 = vld [vmem:[#allocation8 + $0x228] ss:$12 sps:$4 sm:$0xff]  }
 0x103   : > { %1354 = vmatprep.subr.bf16.mxu0 %v4552_v2  ;;  %v4597_v2 = vld [vmem:[#allocation10 + $0x3a4] ss:$24 sps:$4 sm:$0xff]  }
 0x105   : > { %1964 = vmatpush1.bf16.msra.mxu1 %v4456_v50  ;;  %v4583_v50 = vld [vmem:[#allocation10 + $0x2e0] ss:$24 sps:$4 sm:$0xff]  }
 0x106   : > { %1965 = vmatprep.subr.bf16.mxu1 %v4464_v53  ;;  %1355 = vmatpush1.bf16.msra.mxu0 %v4550_v4  ;;  %v4528_v53 = vld [vmem:[#allocation8 + $0x1f8] ss:$12 sps:$4 sm:$0xff]  }
 0x107   : > { %1356 = vmatprep.subr.bf16.mxu0 %v4555_v6  ;;  %v4595_v4 = vld [vmem:[#allocation10 + $0x3a0] ss:$24 sps:$4 sm:$0xff]   ;;  %v4600_v6 = vld [vmem:[#allocation10 + $0x3d4] ss:$24 sps:$4 sm:$0xff]  }
 0x109   : > { %1966 = vmatpush1.bf16.msra.mxu1 %v4462_v54  ;;  %v4533_v54 = vld [vmem:[#allocation8 + $0x214] ss:$12 sps:$4 sm:$0xff]  }
 0x10a   : > { %1967 = vmatprep.subr.bf16.mxu1 %v4470_v55  ;;  %1357 = vmatpush1.bf16.msra.mxu0 %v4553_v8  ;;  %v4588_v55 = vld [vmem:[#allocation10 + $0x314] ss:$24 sps:$4 sm:$0xff]   ;;  %v4598_v8 = vld [vmem:[#allocation10 + $0x3d0] ss:$24 sps:$4 sm:$0xff]  }
 0x10b   : > { %1358 = vmatprep.subr.bf16.mxu0 %v4558_v10  ;;  %v4603_v10 = vld [vmem:[#allocation10 + $0x404] ss:$24 sps:$4 sm:$0xff]  }
 0x10d   : > { %1968 = vmatpush1.bf16.msra.mxu1 %v4468_v60  ;;  %v4591_v60 = vld [vmem:[#allocation10 + $0x344] ss:$24 sps:$4 sm:$0xff]  }
 0x10e   : > { %1969 = vmatprep.subr.bf16.mxu1 %v4476_v62  ;;  %1359 = vmatpush1.bf16.msra.mxu0 %v4556_v12  ;;  %v4594_v62 = vld [vmem:[#allocation10 + $0x374] ss:$24 sps:$4 sm:$0xff]   ;;  %v4618_v12 = vld [vmem:[#allocation8 + $0x1b8] ss:$12 sps:$4 sm:$0xff]  }
 0x10f   : > { %1360 = vmatprep.subr.bf16.mxu0 %v4561_v14  ;;  %v4604_v14 = vld [vmem:[#allocation10 + $0x430] ss:$24 sps:$4 sm:$0xff]  }
 0x111   : > { %1970 = vmatpush1.bf16.msra.mxu1 %v4474_v0  ;;  %v4592_v0 = vld [vmem:[#allocation10 + $0x370] ss:$24 sps:$4 sm:$0xff]  }
 0x112   : > { %1971 = vmatprep.subr.bf16.mxu1 %v4482_v3  ;;  %1361 = vmatpush1.bf16.msra.mxu0 %v4559_v16  ;;  %v5266_v3 = vld [vmem:[%s5223_s12 + $0x8] ss:$0 sps:$4 sm:$0xff]  }
 0x113   : > { %1362 = vmatprep.subr.bf16.mxu0 %v4564_v18  ;;  %v4609_v16 = vld [vmem:[#allocation10 + $0x464] ss:$24 sps:$4 sm:$0xff]   ;;  %v4624_v18 = vld [vmem:[#allocation8 + $0x1e8] ss:$12 sps:$4 sm:$0xff]  }
 0x115   : > { %1972 = vmatpush1.bf16.msra.mxu1 %v4480_v5  ;;  %v4612_v5 = vld [vmem:[#allocation8 + $0x188] ss:$12 sps:$4 sm:$0xff]  }
 0x116   : > { %1973 = vmatprep.subr.bf16.mxu1 %v4488_v7  ;;  %1363 = vmatpush1.bf16.msra.mxu0 %v4562_v20  ;;  %v4978_v7 = vmov 0.0   ;;  %v4611_v20 = vld [vmem:[#allocation8 + $0x8] ss:$12 sps:$4 sm:$0xff]  }
 0x117   : > { %1364 = vmatprep.subr.bf16.mxu0 %v4567_v22  ;;  %v4613_v22 = vld [vmem:[#allocation8 + $0xe0] ss:$12 sps:$4 sm:$0xff]  }
 0x119   : > { %1974 = vmatpush1.bf16.msra.mxu1 %v4486_v9  ;;  %v4615_v9 = vld [vmem:[#allocation8 + $0x1a0] ss:$12 sps:$4 sm:$0xff]  }
 0x11a   : > { %1975 = vmatprep.subr.bf16.mxu1 %v4494_v11  ;;  %1365 = vmatpush1.bf16.msra.mxu0 %v4565_v25  ;;  %v4601_v11 = vld [vmem:[#allocation10 + $0x400] ss:$24 sps:$4 sm:$0xff]  }
 0x11b   : > { %1366 = vmatprep.subr.bf16.mxu0 %v4570_v27  ;;  %v4630_v25 = vld [vmem:[#allocation8 + $0x218] ss:$12 sps:$4 sm:$0xff]  }
 0x11c   : > { %v4617_v27 = vld [vmem:[#allocation8 + $0x38] ss:$12 sps:$4 sm:$0xff]  }
 0x11d   : > { %1976 = vmatpush1.bf16.msra.mxu1 %v4492_v13  ;;  %v4606_v13 = vld [vmem:[#allocation10 + $0x434] ss:$24 sps:$4 sm:$0xff]  }
 0x11e   : > { %1977 = vmatprep.subr.bf16.mxu1 %v4500_v15  ;;  %1367 = vmatpush1.bf16.msra.mxu0 %v4568_v30  ;;  %v4621_v15 = vld [vmem:[#allocation8 + $0x1d0] ss:$12 sps:$4 sm:$0xff]  }
 0x11f   : > { %1368 = vmatprep.subr.bf16.mxu0 %v4573_v32  ;;  %v4619_v30 = vld [vmem:[#allocation8 + $0x110] ss:$12 sps:$4 sm:$0xff]   ;;  %v4623_v32 = vld [vmem:[#allocation8 + $0x68] ss:$12 sps:$4 sm:$0xff]  }
 0x121   : > { %1978 = vmatpush1.bf16.msra.mxu1 %v4498_v17  ;;  %v4607_v17 = vld [vmem:[#allocation10 + $0x460] ss:$24 sps:$4 sm:$0xff]  }
 0x122   : > { %1979 = vmatprep.subr.bf16.mxu1 %v4506_v19  ;;  %1369 = vmatpush1.bf16.msra.mxu0 %v4571_v34  ;;  %v4610_v19 = vld [vmem:[#allocation8 + $0xc8] ss:$12 sps:$4 sm:$0xff]   ;;  %v4628_v34 = vld [vmem:[#allocation8 + $0x158] ss:$12 sps:$4 sm:$0xff]  }
 0x123   : > { %1370 = vmatprep.subr.bf16.mxu0 %v4576_v37  ;;  %v4632_v37 = vld [vmem:[#allocation8 + $0xb0] ss:$12 sps:$4 sm:$0xff]  }
 0x125   : > { %1980 = vmatpush1.bf16.msra.mxu1 %v4504_v21  ;;  %v4627_v21 = vld [vmem:[#allocation8 + $0x200] ss:$12 sps:$4 sm:$0xff]  }
 0x126   : > { %1981 = vmatprep.subr.bf16.mxu1 %v4509_v24  ;;  %1371 = vmatpush1.bf16.msra.mxu0 %v4574_v38  ;;  %v4614_v24 = vld [vmem:[#allocation8 + $0x20] ss:$12 sps:$4 sm:$0xff]  }
 0x127   : > { %1372 = vmatprep.subr.bf16.mxu0 %v4579_v40 }
 0x129   : > { %1982 = vmatpush1.bf16.msra.mxu1 %v4507_v26  ;;  %v4616_v26 = vld [vmem:[#allocation8 + $0xf8] ss:$12 sps:$4 sm:$0xff]  }
 0x12a   : > { %1983 = vmatprep.subr.bf16.mxu1 %v4512_v28  ;;  %1373 = vmatpush1.bf16.msra.mxu0 %v4577_v42  ;;  %v4633_v28 = vld [vmem:[#allocation8 + $0x230] ss:$12 sps:$4 sm:$0xff]  }
 0x12b   : > { %1374 = vmatprep.subr.bf16.mxu0 %v4582_v44 }
 0x12d   : > { %1984 = vmatpush1.bf16.msra.mxu1 %v4510_v31  ;;  %v4622_v31 = vld [vmem:[#allocation8 + $0x128] ss:$12 sps:$4 sm:$0xff]  }
 0x12e   : > { %1994 = vmatprep.subr.bf16.mxu1 %v4515_v33  ;;  %1375 = vmatpush1.bf16.msra.mxu0 %v4580_v46  ;;  %v4626_v33 = vld [vmem:[#allocation8 + $0x80] ss:$12 sps:$4 sm:$0xff]  }
 0x12f   : > { %1376 = vmatprep.subr.bf16.mxu0 %v4585_v48 }
 0x130   : > { %1986 = vmatmul.mubr.bf16.vlgmr.msra.gmra.mrb[4].mxu1 %v5248_v58 }
 0x131   : > { %1995 = vmatpush1.bf16.msra.mxu1 %v4513_v35  ;;  %2026 = vmatprep.mubr.bf16.mxu1 %v4977_v1  ;;  %v4629_v35 = vld [vmem:[#allocation8 + $0x98] ss:$12 sps:$4 sm:$0xff]  }
 0x132   : > { %1996 = vmatprep.subr.bf16.mxu1 %v4518_v36  ;;  %1377 = vmatpush1.bf16.msra.mxu0 %v4583_v50  ;;  %v4631_v36 = vld [vmem:[#allocation8 + $0x170] ss:$12 sps:$4 sm:$0xff]  }
 0x133   : > { %1387 = vmatprep.subr.bf16.mxu0 %v4588_v55 }
 0x135   : > { %1997 = vmatpush1.bf16.msra.mxu1 %v4516_v39  ;;  %1379 = vmatmul.mubr.bf16.vlgmr.msra.gmra.mrb[4].mxu0 %v5248_v58 }
 0x136   : > { %1998 = vmatprep.subr.bf16.mxu1 %v4521_v41  ;;  %1419 = vmatprep.mubr.bf16.mxu0 %v4977_v1 }
 0x137   : > { %1388 = vmatpush1.bf16.msra.mxu0 %v4586_v56 }
 0x138   : > { %1389 = vmatprep.subr.bf16.mxu0 %v4591_v60 }
 0x139   : > { %1999 = vmatpush1.bf16.msra.mxu1 %v4519_v43 }
 0x13a   : > { %2000 = vmatprep.subr.bf16.mxu1 %v4524_v45 }
 0x13b   : > { %1390 = vmatpush1.bf16.msra.mxu0 %v4589_v61 }
 0x13c   : > { %1391 = vmatprep.subr.bf16.mxu0 %v4594_v62 }
 0x13d   : > { %2001 = vmatpush1.bf16.msra.mxu1 %v4522_v47 }
 0x13e   : > { %2002 = vmatprep.subr.bf16.mxu1 %v4527_v49 }
 0x13f   : > { %1392 = vmatpush1.bf16.msra.mxu0 %v4592_v0 }
 0x140   : > { %1393 = vmatprep.subr.bf16.mxu0 %v4597_v2 }
 0x141   : > { %2003 = vmatpush1.bf16.msra.mxu1 %v4525_v51 }
 0x142   : > { %2004 = vmatprep.subr.bf16.mxu1 %v4530_v52 }
 0x143   : > { %1394 = vmatpush1.bf16.msra.mxu0 %v4595_v4 }
 0x144   : > { %1395 = vmatprep.subr.bf16.mxu0 %v4600_v6 }
 0x145   : > { %2005 = vmatpush1.bf16.msra.mxu1 %v4528_v53 }
 0x146   : > { %2006 = vmatprep.subr.bf16.mxu1 %v4533_v54 }
 0x147   : > { %1396 = vmatpush1.bf16.msra.mxu0 %v4598_v8 }
 0x148   : > { %1397 = vmatprep.subr.bf16.mxu0 %v4603_v10 }
 0x149   : > { %2007 = vmatpush1.bf16.msra.mxu1 %v4531_v57 }
 0x14a   : > { %2008 = vmatprep.subr.bf16.mxu1 %v4536_v59 }
 0x14b   : > { %1398 = vmatpush1.bf16.msra.mxu0 %v4601_v11 }
 0x14c   : > { %1399 = vmatprep.subr.bf16.mxu0 %v4606_v13 }
 0x14d   : > { %2009 = vmatpush1.bf16.msra.mxu1 %v4534_v63 }
 0x14e   : > { %4078 = vmatprep.subr.bf16.mxu1 %v4978_v7 }
 0x14f   : > { %1400 = vmatpush1.bf16.msra.mxu0 %v4604_v14 }
 0x150   : > { %2027 = vmatmul.mubr.bf16.vlgmr.msra.gmra.mrb[4].mxu1 %v5266_v3  ;;  %1401 = vmatprep.subr.bf16.mxu0 %v4609_v16 }
 0x151   : > { %4079 = vmatpush3.bf16.msra.mxu1 %v4612_v5  ;;  %4094 = vmatprep.mubr.msk.bf16.mxu1 %vm4979_vm0, %v4978_v7 }
 0x152   : > { %4080 = vmatprep.subr.bf16.mxu1 %v4978_v7 }
 0x153   : > { %1402 = vmatpush1.bf16.msra.mxu0 %v4607_v17 }
 0x154   : > { %3992 = vmatprep.subr.bf16.mxu0 %v4610_v19 }
 0x155   : > { %4081 = vmatpush3.bf16.msra.mxu1 %v4615_v9 }
 0x156   : > { %4082 = vmatprep.subr.bf16.mxu1 %v4978_v7  ;;  %1420 = vmatmul.mubr.bf16.vlgmr.msra.gmra.mrb[4].mxu0 %v5255_v29  ;;  %v4620_v29 = vld [vmem:[#allocation8 + $0x50] ss:$12 sps:$4 sm:$0xff]  }
 0x157   : > { %3993 = vmatpush3.bf16.msra.mxu0 %v4611_v20  ;;  %2067 = vmatprep.mubr.bf16.mxu0 %v5242_v23  ;;  %v4625_v23 = vld [vmem:[#allocation8 + $0x140] ss:$12 sps:$4 sm:$0xff]  }
 0x158   : > { %3994 = vmatprep.subr.bf16.mxu0 %v4613_v22 }
 0x159   : > { %4083 = vmatpush3.bf16.msra.mxu1 %v4618_v12 }
 0x15a   : > { %4084 = vmatprep.subr.bf16.mxu1 %v4978_v7 }
 0x15b   : > { %3995 = vmatpush3.bf16.msra.mxu0 %v4614_v24  ;;  %v2133_v24 = vlaneseq }
 0x15c   : > { %3996 = vmatprep.subr.bf16.mxu0 %v4616_v26 }
 0x15d   : > { %4085 = vmatpush3.bf16.msra.mxu1 %v4621_v15  ;;  %v2138_v26 = vand.u32 127, %v2133_v24 }
 0x15e   : > { %4086 = vmatprep.subr.bf16.mxu1 %v4978_v7 }
 0x15f   : > { %3997 = vmatpush3.bf16.msra.mxu0 %v4617_v27 }
 0x160   : > { %3998 = vmatprep.subr.bf16.mxu0 %v4619_v30 }
 0x161   : > { %4087 = vmatpush3.bf16.msra.mxu1 %v4624_v18 }
 0x162   : > { %4088 = vmatprep.subr.bf16.mxu1 %v4978_v7 }
 0x163   : > { %3999 = vmatpush3.bf16.msra.mxu0 %v4620_v29 }
 0x164   : > { %4000 = vmatprep.subr.bf16.mxu0 %v4622_v31 }
 0x165   : > { %4089 = vmatpush3.bf16.msra.mxu1 %v4627_v21 }
 0x166   : > { %4090 = vmatprep.subr.bf16.mxu1 %v4978_v7 }
 0x167   : > { %4001 = vmatpush3.bf16.msra.mxu0 %v4623_v32 }
 0x168   : > { %4002 = vmatprep.subr.bf16.mxu0 %v4625_v23 }
 0x169   : > { %4091 = vmatpush3.bf16.msra.mxu1 %v4630_v25  ;;  %v5306_v25 = vshrl.u32 %v2133_v24, 7 }
 0x16a   : > { %4092 = vmatprep.subr.bf16.mxu1 %v4978_v7 }
 0x16b   : > { %4003 = vmatpush3.bf16.msra.mxu0 %v4626_v33  ;;  %vm5309_vm3 = vcmp.le.s32.totalorder %v2138_v26, %v5306_v25 }
 0x16c   : > { %4004 = vmatprep.subr.bf16.mxu0 %v4628_v34 }
 0x16d   : > { %4093 = vmatpush3.bf16.msra.mxu1 %v4633_v28 }
 0x16e   : > { %4098 = vmatprep.subr.bf16.mxu1 %v4978_v7 }
 0x16f   : > { %4005 = vmatpush3.bf16.msra.mxu0 %v4629_v35 }
 0x170   : > { %4095 = vmatmul.mubr.bf16.vlgmr.msra.gmra.mrb[8].mxu1 %v5266_v3  ;;  %4006 = vmatprep.subr.bf16.mxu0 %v4631_v36 }
 0x171   : > { %4100 = vmatprep.mubr.msk.bf16.mxu1 %vm4979_vm0, %v4978_v7 }
 0x173   : > { %4007 = vmatpush3.bf16.msra.mxu0 %v4632_v37 }
 0x174   : > { %4122 = vmatprep.subr.bf16.mxu0 %v4978_v7 }
 0x176   : > { %2068 = vmatmul.mubr.bf16.vlgmr.msra.gmra.mrb[8].mxu0 %v5248_v58 }
 0x177   : > { %4124 = vmatprep.mubr.msk.bf16.mxu0 %vm4979_vm0, %v4978_v7 }
 0x1c3   : > { %v1339_v38 = vpop.f32.mrb[0].mxu1 }
 0x1c4   : > { %v1341_v39 = vpop.f32.mrb[1].mxu1 }
 0x1c5   : > { %v3988_v40 = vpack.c.bf16 %v1341_v39, %v1339_v38  ;;  %v1343_v41 = vpop.f32.mrb[2].mxu1 }
 0x1c6   : > { %v1344_v42 = vpop.f32.mrb[3].mxu1 }
 0x1c7   : > { %1453 = vst [vmem:[#allocation2 + $0x8] sm:$0xff] %v3988_v40 }
 0x1c8   : > { %v1257_v43 = vpop.f32.mrb[0].mxu0 }
 0x1c9   : > { %v1259_v44 = vpop.f32.mrb[1].mxu0 }
 0x1ca   : > { %v3987_v45 = vpack.c.bf16 %v1259_v44, %v1257_v43  ;;  %v1261_v46 = vpop.f32.mrb[2].mxu0 }
 0x1cb   : > { %v1262_v47 = vpop.f32.mrb[3].mxu0 }
 0x1cc   : > { %1452 = vst [vmem:[#allocation2] sm:$0xff] %v3987_v45 }
 0x1ce   : > { %v2142_v60 = vld [vmem:[#allocation2 + $0xc] sm:$0xf]  ;;  %v4637_v5 = vld [vmem:[#allocation2 + $0x8] ss:$0 sps:$4 sm:$0xff]  }
 0x1cf   : > { %v2209_v63 = vsel %vm2207_vm2, %v2142_v60, 0 }
 0x1d3   : > { %v2141_v48 = vld [vmem:[#allocation2] sm:$0xf]  ;;  %v2382_v49 = vld [vmem:[#allocation2 + $0x4] sm:$0xf] }
 0x1d4   : > { %v2148_v58 = vsel %vm2143_vm1, %v2141_v48, 0  ;;  %v2388_v50 = vsel %vm2143_vm1, %v2382_v49, 0  ;;  %v4634_v51 = vld [vmem:[#allocation2] ss:$0 sps:$4 sm:$0xff]   ;;  %v4639_v42 = vld [vmem:[#allocation2 + $0x4] ss:$0 sps:$4 sm:$0xff]  }
 0x1d5   : > { %4099 = vmatpush3.bf16.xpose.msra.mxu1 %v2148_v58  ;;  %4123 = vmatpush3.bf16.xpose.msra.mxu0 %v2388_v50  ;;  %v2619_v58 = vld [vmem:[#allocation2 + $0x8] sm:$0xf] }
 0x1d6   : > { %2263 = vrot.lane.b32.xlu1 %v4634_v51, %s4980_s26  ;;  %4104 = vmatprep.subr.bf16.mxu1 %v4978_v7 }
 0x1d7   : > { %4134 = vmatprep.subr.bf16.mxu0 %v4978_v7 }
 0x223   : > { %v2028_v52 = vpop.f32.mrb[4].mxu1 }
 0x224   : > { %v2115_v53 = vmul.f32 0.05103104, %v2028_v52  ;;  %v2030_v54 = vpop.f32.mrb[5].mxu1 }
 0x225   : > { %v2116_v55 = vmul.f32 0.05103104, %v2030_v54  ;;  %v2032_v56 = vpop.f32.mrb[6].mxu1 }
 0x226   : > { %v2033_v57 = vpop.f32.mrb[7].mxu1 }
 0x227   : > { %v3990_v59 = vpack.c.bf16 %v2116_v55, %v2115_v53  ;;  %v2625_v53 = vsel %vm2143_vm1, %v2619_v58, 0 }
 0x229   : > { %2131 = vst [vmem:[#allocation3] sm:$0xff] %v3990_v59  ;;  %v1421_v3 = vpop.f32.mrb[4].mxu0 }
 0x22a   : > { %v1423_v4 = vpop.f32.mrb[5].mxu0 }
 0x22b   : > { %v3989_v6 = vpack.c.bf16 %v1423_v4, %v1421_v3  ;;  %v1425_v8 = vpop.f32.mrb[6].mxu0 }
 0x22c   : > { %v1426_v9 = vpop.f32.mrb[7].mxu0 }
 0x22d   : > { %1454 = vst [vmem:[#allocation2 + $0x10] sm:$0xff] %v3989_v6 }
 0x230   : > { %v2140_v61 = vld [vmem:[#allocation3] sm:$0xf]  ;;  %v2381_v62 = vld [vmem:[#allocation3 + $0x4] sm:$0xf] }
 0x231   : > { %4101 = vmatmul.mubr.msk.bf16.vlgmr.msra.gmra.mrb[12].mxu1 %vm2143_vm1, %v2140_v61  ;;  %4125 = vmatmul.mubr.msk.bf16.vlgmr.msra.gmra.mrb[12].mxu0 %vm2143_vm1, %v2381_v62  ;;  %v4635_v0 = vld [vmem:[#allocation3] ss:$0 sps:$4 sm:$0xff]   ;;  %v4636_v2 = vld [vmem:[#allocation3 + $0x4] ss:$0 sps:$4 sm:$0xff]  }
 0x232   : > { %4105 = vmatpush3.bf16.msra.mxu1 %v2209_v63  ;;  %4136 = vmatprep.mubr.msk.bf16.mxu0 %vm4979_vm0, %v4978_v7 }
 0x233   : > { %2258 = vrot.lane.b32.xlu1 %v4635_v0, %s4980_s26  ;;  %4106 = vmatprep.mubr.msk.bf16.mxu1 %vm4979_vm0, %v4978_v7 }
 0x234   : > { %4110 = vmatprep.subr.bf16.mxu1 %v4978_v7 }
 0x237   : > { %2496 = vrot.lane.b32.xlu1 %v4636_v2, %s4980_s26 }
 0x23b   : > { %2738 = vrot.lane.b32.xlu1 %v4637_v5, %s4980_s26 }
 0x243   : > { %v2109_v10 = vpop.f32.mrb[8].mxu1 }
 0x244   : > { %v4096_v11 = vpop.f32.mrb[9].mxu1 }
 0x245   : > { %v2112_v12 = vpop.f32.mrb[10].mxu1 }
 0x246   : > { %v4097_v13 = vpop.f32.mrb[11].mxu1 }
 0x248   : > { %v2264_v46 = vpop.permute.xlu1 %2263 }
 0x249   : > { %v4008_v14 = vpop.f32.mrb[8].mxu0  ;;  %v2269_v55 = vsel %vm2143_vm1, %v2264_v46, 0 }
 0x24a   : > { %v4009_v15 = vpop.f32.mrb[9].mxu0 }
 0x24b   : > { %v4010_v16 = vadd.f32 %v4009_v15, %v4008_v14  ;;  %v4011_v17 = vpop.f32.mrb[10].mxu0 }
 0x24c   : > { %v4012_v18 = vpop.f32.mrb[11].mxu0 }
 0x24d   : > { %v2110_v19 = vadd.f32 %v4010_v16, %v2109_v10 }
 0x24f   : > { %v2117_v20 = vmul.f32 0.05103104, %v2110_v19 }
 0x251   : > { %v3991_v21 = vpack.c.bf16 %v2117_v20, %v2117_v20 }
 0x253   : > { %2132 = vst [vmem:[#allocation3 + $0x8] sm:$0xf] %v3991_v21 }
 0x25a   : > { %v4638_v22 = vld [vmem:[#allocation3 + $0x8] ss:$0 sps:$4 sm:$0xff]  }
 0x25b   : > { %2733 = vrot.lane.b32.xlu1 %v4638_v22, %s4980_s26  ;;  %v2618_v57 = vld [vmem:[#allocation3 + $0x8] sm:$0xf] }
 0x2a5   : > { %v2259_v49 = vpop.permute.xlu1 %2258 }
 0x2a9   : > { %v2497_v51 = vpop.permute.xlu1 %2496 }
 0x2ad   : > { %v2739_v56 = vpop.permute.xlu1 %2738 }
 0x2ae   : > { %v2744_v59 = vsel %vm2143_vm1, %v2739_v56, 0  ;;  %v4641_v56 = vld [vmem:[#allocation2 + $0x10] ss:$0 sps:$4 sm:$0xff]  }
 0x2cd   : > { %v2734_v60 = vpop.permute.xlu1 %2733 }
 0x304   : > { %v2184_v28 = vpop.f32.mrb[12].mxu1  ;;  %v2424_v30 = vpop.f32.mrb[12].mxu0 }
 0x305   : > { %v2190_v29 = vsel %vm5309_vm3, %v2184_v28, -1e+30  ;;  %v4102_v31 = vpop.f32.mrb[13].mxu1  ;;  %v4126_v32 = vpop.f32.mrb[13].mxu0  ;;  %v2430_v43 = vsel %vm5309_vm3, %v2424_v30, -1e+30 }
 0x306   : > { %v2187_v23 = vpop.f32.mrb[14].mxu1  ;;  %v2427_v33 = vpop.f32.mrb[14].mxu0  ;;  %v2192_v34 = vsel %vm2191_vm4, %v2190_v29, -inf  ;;  %v2431_v44 = vsel %vm2191_vm4, %v2430_v43, -inf }
 0x307   : > { %2193 = vmax.xlane.f32.xlu0 %v2192_v34  ;;  %v4103_v35 = vpop.f32.mrb[15].mxu1  ;;  %v4127_v36 = vpop.f32.mrb[15].mxu0  ;;  %v4640_v34 = vld [vmem:[#allocation2 + $0xc] ss:$0 sps:$4 sm:$0xff]  }
 0x394   : > { %v2194_v37 = vpop.xlane.xlu0 %2193 }
 0x395   : > { %v2195_v38 = vsub.f32 %v2190_v29, %v2194_v37 }
 0x397   : > { %v2196_v39 = vmul.f32 1.442695, %v2195_v38 }
 0x399   : > { %4739 = vpow2.f32 %v2196_v39 }
 0x3a3   : > { %v4740_v40 = vpop.eup %4739 }
 0x3a4   : > { %v2198_v41 = vsel %vm2191_vm4, %v4740_v40, 0.0 }
 0x3a5   : > { %2199 = vadd.xlane.f32.xlu0 %v2198_v41 }
 0x3bb   : > { %2501 = vrot.lane.b32.xlu0 %v4639_v42, %s4980_s26 }
 0x3da   : > { %2432 = vmax.xlane.f32.xlu0 %v2431_v44 }
 0x432   : > { %v2200_v45 = vpop.xlane.xlu0 %2199 }
 0x433   : > { %4741 = vrcp.f32 %v2200_v45 }
 0x436   : > { %v2502_v47 = vpop.permute.xlu0 %2501 }
 0x437   : > { %v2507_v48 = vsel %vm2143_vm1, %v2502_v47, 0 }
 0x438   : > { %4135 = vmatpush3.bf16.xpose.msra.mxu0 %v2507_v48 }
 0x439   : > { %4146 = vmatprep.subr.bf16.mxu0 %v4978_v7 }
 0x43d   : > { %v4742_v50 = vpop.eup %4741 }
 0x43e   : > { %v2202_v52 = vmul.f32 %v4742_v50, %v4740_v40 }
 0x43f   : > { %4137 = vmatmul.mubr.msk.bf16.vlgmr.msra.gmra.mrb[16].mxu0 %vm2143_vm1, %v2497_v51 }
 0x440   : > { %4147 = vmatpush3.bf16.xpose.msra.mxu0 %v2625_v53  ;;  %v2203_v54 = vpack.c.bf16 %v2202_v52, %v2202_v52  ;;  %4148 = vmatprep.mubr.msk.bf16.mxu0 %vm4979_vm0, %v4978_v7 }
 0x441   : > { %4158 = vmatprep.subr.bf16.mxu0 %v4978_v7 }
 0x442   : > { %4107 = vmatmul.mubr.msk.bf16.vlgmr.msra.gmra.mrb[16].mxu1 %vm2191_vm4, %v2203_v54 }
 0x443   : > { %4111 = vmatpush3.bf16.xpose.msra.mxu1 %v2269_v55  ;;  %4112 = vmatprep.mubr.msk.bf16.mxu1 %vm4979_vm0, %v4978_v7 }
 0x444   : > { %4116 = vmatprep.subr.bf16.mxu1 %v4978_v7 }
 0x447   : > { %4149 = vmatmul.mubr.msk.bf16.vlgmr.msra.gmra.mrb[20].mxu0 %vm2143_vm1, %v2618_v57  ;;  %v4642_v57 = vld [vmem:[#allocation2 + $0x14] ss:$0 sps:$4 sm:$0xff]  }
 0x448   : > { %4159 = vmatpush3.bf16.xpose.msra.mxu0 %v2744_v59  ;;  %4160 = vmatprep.mubr.msk.bf16.mxu0 %vm4979_vm0, %v4978_v7 }
 0x44a   : > { %4113 = vmatmul.mubr.msk.bf16.vlgmr.msra.gmra.mrb[20].mxu1 %vm2143_vm1, %v2259_v49 }
 0x44b   : > { %4118 = vmatprep.mubr.msk.bf16.mxu1 %vm4979_vm0, %v4978_v7 }
 0x44f   : > { %4161 = vmatmul.mubr.msk.bf16.vlgmr.msra.gmra.mrb[24].mxu0 %vm2143_vm1, %v2734_v60 }
 0x467   : > { %v2433_v61 = vpop.xlane.xlu0 %2432 }
 0x468   : > { %v2434_v63 = vsub.f32 %v2430_v43, %v2433_v61 }
 0x46a   : > { %v2435_v6 = vmul.f32 1.442695, %v2434_v63  ;;  %v2383_v63 = vld [vmem:[#allocation2 + $0x10] sm:$0xf] }
 0x46c   : > { %4743 = vpow2.f32 %v2435_v6 }
 0x476   : > { %v4744_v31 = vpop.eup %4743 }
 0x477   : > { %v2437_v33 = vsel %vm2191_vm4, %v4744_v31, 0.0 }
 0x512   : > { %v2543_v62 = vpop.f32.mrb[16].mxu0 }
 0x513   : > { %v4138_v0 = vpop.f32.mrb[17].mxu0  ;;  %v2549_v19 = vsel %vm5309_vm3, %v2543_v62, -1e+30 }
 0x514   : > { %v2546_v2 = vpop.f32.mrb[18].mxu0  ;;  %v2550_v26 = vsel %vm2191_vm4, %v2549_v19, -inf }
 0x515   : > { %v2245_v3 = vpop.f32.mrb[16].mxu1  ;;  %v4139_v4 = vpop.f32.mrb[19].mxu0 }
 0x516   : > { %2251 = vst.msk [vmem:[#allocation4] sm:$0xff] %vm2143_vm1, %v2245_v3  ;;  %v4108_v5 = vpop.f32.mrb[17].mxu1  ;;  %v2447_v4 = vsel %vm2207_vm2, %v2383_v63, 0 }
 0x517   : > { %v2248_v8 = vpop.f32.mrb[18].mxu1 }
 0x518   : > { %v4109_v9 = vpop.f32.mrb[19].mxu1 }
 0x51a   : > { %v2661_v10 = vpop.f32.mrb[20].mxu0 }
 0x51b   : > { %v4150_v11 = vpop.f32.mrb[21].mxu0  ;;  %v2667_v28 = vsel %vm5309_vm3, %v2661_v10, -1e+30 }
 0x51c   : > { %v2664_v12 = vpop.f32.mrb[22].mxu0  ;;  %v2668_v23 = vsel %vm2191_vm4, %v2667_v28, -inf }
 0x51d   : > { %v2305_v13 = vpop.f32.mrb[20].mxu1  ;;  %v4151_v14 = vpop.f32.mrb[23].mxu0 }
 0x51e   : > { %v2311_v15 = vsel %vm5309_vm3, %v2305_v13, -1e+30  ;;  %v4114_v16 = vpop.f32.mrb[21].mxu1  ;;  %v2620_v13 = vld [vmem:[#allocation2 + $0x14] sm:$0xf] }
 0x51f   : > { %v2308_v17 = vpop.f32.mrb[22].mxu1  ;;  %v2312_v18 = vsel %vm2191_vm4, %v2311_v15, -inf  ;;  %v2684_v16 = vsel %vm2207_vm2, %v2620_v13, 0 }
 0x520   : > { %v4115_v20 = vpop.f32.mrb[23].mxu1  ;;  %2313 = vmax.xlane.f32.xlu1 %v2312_v18 }
 0x522   : > { %v2780_v21 = vpop.f32.mrb[24].mxu0 }
 0x523   : > { %v2786_v22 = vsel %vm5309_vm3, %v2780_v21, -1e+30  ;;  %v4162_v24 = vpop.f32.mrb[25].mxu0 }
 0x524   : > { %2551 = vmax.xlane.f32.xlu1 %v2550_v26  ;;  %v2783_v30 = vpop.f32.mrb[26].mxu0  ;;  %v2787_v29 = vsel %vm2191_vm4, %v2786_v22, -inf  ;;  %v4643_v26 = vld [vmem:[#allocation11] ss:$12 sps:$4 sm:$0xff]  }
 0x525   : > { %2788 = vmax.xlane.f32.xlu0 %v2787_v29  ;;  %v4163_v32 = vpop.f32.mrb[27].mxu0  ;;  %v4648_v30 = vld [vmem:[#allocation11 + $0x1c] ss:$12 sps:$4 sm:$0xff]   ;;  %v4646_v29 = vld [vmem:[#allocation11 + $0x18] ss:$12 sps:$4 sm:$0xff]  }
 0x526   : > { %v4670_v32 = vld [vmem:[#allocation11 + $0xc8] ss:$12 sps:$4 sm:$0xff]  }
 0x528   : > { %2669 = vmax.xlane.f32.xlu1 %v2668_v23  ;;  %v4671_v23 = vld [vmem:[#allocation11 + $0x8] ss:$12 sps:$4 sm:$0xff]  }
 0x529   : > { %2438 = vadd.xlane.f32.xlu0 %v2437_v33  ;;  %v4649_v33 = vld [vmem:[#allocation11 + $0x30] ss:$12 sps:$4 sm:$0xff]  }
 0x53f   : > { %2327 = vrot.lane.b32.xlu0 %v4640_v34, %s4980_s26  ;;  %v4675_v34 = vld [vmem:[#allocation11 + $0xe0] ss:$12 sps:$4 sm:$0xff]  }
 0x5ad   : > { %v2314_v35 = vpop.xlane.xlu1 %2313 }
 0x5ae   : > { %v2315_v36 = vsub.f32 %v2311_v15, %v2314_v35  ;;  %v4654_v35 = vld [vmem:[#allocation11 + $0x4c] ss:$12 sps:$4 sm:$0xff]  }
 0x5b0   : > { %v2316_v27 = vmul.f32 1.442695, %v2315_v36  ;;  %v4676_v36 = vld [vmem:[#allocation11 + $0x20] ss:$12 sps:$4 sm:$0xff]  }
 0x5b1   : > { %v2552_v37 = vpop.xlane.xlu1 %2551 }
 0x5b2   : > { %4745 = vpow2.f32 %v2316_v27  ;;  %v2553_v38 = vsub.f32 %v2549_v19, %v2552_v37  ;;  %v2789_v39 = vpop.xlane.xlu0 %2788  ;;  %v4680_v27 = vld [vmem:[#allocation11 + $0xf8] ss:$12 sps:$4 sm:$0xff]   ;;  %v4652_v37 = vld [vmem:[#allocation11 + $0x48] ss:$12 sps:$4 sm:$0xff]  }
 0x5b3   : > { %v2790_v40 = vsub.f32 %v2786_v22, %v2789_v39  ;;  %v4681_v39 = vld [vmem:[#allocation11 + $0x38] ss:$12 sps:$4 sm:$0xff]  }
 0x5b4   : > { %v2554_v41 = vmul.f32 1.442695, %v2553_v38  ;;  %v4657_v38 = vld [vmem:[#allocation11 + $0x64] ss:$12 sps:$4 sm:$0xff]  }
 0x5b5   : > { %v2791_v42 = vmul.f32 1.442695, %v2790_v40  ;;  %v2670_v43 = vpop.xlane.xlu1 %2669  ;;  %v4685_v40 = vld [vmem:[#allocation11 + $0x110] ss:$12 sps:$4 sm:$0xff]  }
 0x5b6   : > { %4747 = vpow2.f32 %v2554_v41  ;;  %v2671_v44 = vsub.f32 %v2667_v28, %v2670_v43  ;;  %v2439_v45 = vpop.xlane.xlu0 %2438  ;;  %v4645_v28 = vld [vmem:[#allocation11 + $0x4] ss:$12 sps:$4 sm:$0xff]   ;;  %v4655_v41 = vld [vmem:[#allocation11 + $0x60] ss:$12 sps:$4 sm:$0xff]  }
 0x5b7   : > { %4749 = vpow2.f32 %v2791_v42  ;;  %3358 = vmatprep.subr.bf16.mxu0 %v4645_v28  ;;  %v4660_v42 = vld [vmem:[#allocation11 + $0x7c] ss:$12 sps:$4 sm:$0xff]  }
 0x5b8   : > { %v2672_v46 = vmul.f32 1.442695, %v2671_v44  ;;  %3359 = vmatpush1.bf16.msra.mxu0 %v4643_v26  ;;  %v4686_v43 = vld [vmem:[#allocation11 + $0x50] ss:$12 sps:$4 sm:$0xff]   ;;  %v4690_v44 = vld [vmem:[#allocation11 + $0x128] ss:$12 sps:$4 sm:$0xff]  }
 0x5b9   : > { %3360 = vmatprep.subr.bf16.mxu0 %v4648_v30 }
 0x5ba   : > { %4751 = vpow2.f32 %v2672_v46  ;;  %v2328_v47 = vpop.permute.xlu0 %2327  ;;  %v4663_v46 = vld [vmem:[#allocation11 + $0x94] ss:$12 sps:$4 sm:$0xff]  }
 0x5bb   : > { %v2333_v48 = vsel %vm2207_vm2, %v2328_v47, 0  ;;  %v4691_v47 = vld [vmem:[#allocation11 + $0x68] ss:$12 sps:$4 sm:$0xff]  }
 0x5bc   : > { %v4746_v49 = vpop.eup %4745  ;;  %4117 = vmatpush3.bf16.msra.mxu1 %v2333_v48  ;;  %3361 = vmatpush1.bf16.msra.mxu0 %v4646_v29  ;;  %v4661_v48 = vld [vmem:[#allocation11 + $0x90] ss:$12 sps:$4 sm:$0xff]  }
 0x5bd   : > { %v2318_v58 = vsel %vm2191_vm4, %v4746_v49, 0.0  ;;  %4128 = vmatprep.subr.bf16.mxu1 %v4978_v7 }
 0x5be   : > { %2319 = vadd.xlane.f32.xlu1 %v2318_v58  ;;  %v4664_v58 = vld [vmem:[#allocation11 + $0xa8] ss:$12 sps:$4 sm:$0xff]  }
 0x5c0   : > { %v4748_v50 = vpop.eup %4747 }
 0x5c1   : > { %v4750_v51 = vpop.eup %4749  ;;  %v2556_v52 = vsel %vm2191_vm4, %v4748_v50, 0.0 }
 0x5c2   : > { %2557 = vadd.xlane.f32.xlu1 %v2556_v52  ;;  %v2793_v53 = vsel %vm2191_vm4, %v4750_v51, 0.0  ;;  %v4674_v52 = vld [vmem:[#allocation11 + $0xdc] ss:$12 sps:$4 sm:$0xff]  }
 0x5c3   : > { %2794 = vadd.xlane.f32.xlu0 %v2793_v53  ;;  %v4672_v53 = vld [vmem:[#allocation11 + $0xd8] ss:$12 sps:$4 sm:$0xff]  }
 0x5c4   : > { %v4752_v54 = vpop.eup %4751 }
 0x5c5   : > { %v2674_v55 = vsel %vm2191_vm4, %v4752_v54, 0.0 }
 0x5c6   : > { %2675 = vadd.xlane.f32.xlu1 %v2674_v55  ;;  %v4677_v55 = vld [vmem:[#allocation11 + $0xf0] ss:$12 sps:$4 sm:$0xff]  }
 0x5d7   : > { %2565 = vrot.lane.b32.xlu1 %v4641_v56, %s4980_s26  ;;  %v4684_v56 = vld [vmem:[#allocation11 + $0x10c] ss:$12 sps:$4 sm:$0xff]  }
 0x5db   : > { %2802 = vrot.lane.b32.xlu1 %v4642_v57, %s4980_s26  ;;  %v4682_v57 = vld [vmem:[#allocation11 + $0x108] ss:$12 sps:$4 sm:$0xff]  }
 0x64b   : > { %v2320_v59 = vpop.xlane.xlu1 %2319 }
 0x64c   : > { %4753 = vrcp.f32 %v2320_v59  ;;  %v4689_v59 = vld [vmem:[#allocation11 + $0x124] ss:$12 sps:$4 sm:$0xff]  }
 0x64d   : > { %4755 = vrcp.f32 %v2439_v45  ;;  %v4658_v45 = vld [vmem:[#allocation11 + $0x78] ss:$12 sps:$4 sm:$0xff]  }
 0x64f   : > { %v2558_v60 = vpop.xlane.xlu1 %2557 }
 0x650   : > { %4757 = vrcp.f32 %v2558_v60  ;;  %v2795_v12 = vpop.xlane.xlu0 %2794  ;;  %v4687_v60 = vld [vmem:[#allocation11 + $0x120] ss:$12 sps:$4 sm:$0xff]  }
 0x653   : > { %v2676_v3 = vpop.xlane.xlu1 %2675 }
 0x654   : > { %4759 = vrcp.f32 %v2676_v3  ;;  %v4694_v3 = vld [vmem:[#allocation11 + $0x13c] ss:$12 sps:$4 sm:$0xff]  }
 0x655   : > { %4761 = vrcp.f32 %v2795_v12  ;;  %v4701_v12 = vld [vmem:[#allocation11 + $0x98] ss:$12 sps:$4 sm:$0xff]  }
 0x656   : > { %v4754_v61 = vpop.eup %4753 }
 0x657   : > { %v2322_v62 = vmul.f32 %v4754_v61, %v4746_v49  ;;  %v4756_v2 = vpop.eup %4755  ;;  %v2566_v6 = vpop.permute.xlu1 %2565  ;;  %v4666_v49 = vld [vmem:[#allocation11 + $0xac] ss:$12 sps:$4 sm:$0xff]  }
 0x658   : > { %v2441_v5 = vmul.f32 %v4756_v2, %v4744_v31  ;;  %v2571_v10 = vsel %vm2207_vm2, %v2566_v6, 0  ;;  %v4651_v31 = vld [vmem:[#allocation11 + $0x34] ss:$12 sps:$4 sm:$0xff]   ;;  %v4692_v2 = vld [vmem:[#allocation11 + $0x138] ss:$12 sps:$4 sm:$0xff]  }
 0x659   : > { %v2323_v0 = vpack.c.bf16 %v2322_v62, %v2322_v62  ;;  %3362 = vmatprep.subr.bf16.mxu0 %v4651_v31 }
 0x65a   : > { %v2442_v8 = vpack.c.bf16 %v2441_v5, %v2441_v5  ;;  %v4758_v9 = vpop.eup %4757  ;;  %3363 = vmatpush1.bf16.msra.mxu0 %v4649_v33  ;;  %v4696_v5 = vld [vmem:[#allocation11 + $0x80] ss:$12 sps:$4 sm:$0xff]  }
 0x65b   : > { %4119 = vmatmul.mubr.msk.bf16.vlgmr.msra.gmra.mrb[24].mxu1 %vm2191_vm4, %v2323_v0  ;;  %v2560_v11 = vmul.f32 %v4758_v9, %v4748_v50  ;;  %v2803_v18 = vpop.permute.xlu1 %2802  ;;  %3364 = vmatprep.subr.bf16.mxu0 %v4654_v35  ;;  %v4669_v50 = vld [vmem:[#allocation11 + $0xc4] ss:$12 sps:$4 sm:$0xff]   ;;  %v4699_v9 = vld [vmem:[#allocation11 + $0x154] ss:$12 sps:$4 sm:$0xff]  }
 0x65c   : > { %4129 = vmatpush3.bf16.msra.mxu1 %v2447_v4  ;;  %4130 = vmatprep.mubr.msk.bf16.mxu1 %vm4979_vm0, %v4978_v7  ;;  %v2808_v21 = vsel %vm2207_vm2, %v2803_v18, 0  ;;  %v4695_v4 = vld [vmem:[#allocation11 + $0x140] ss:$12 sps:$4 sm:$0xff]   ;;  %v4706_v18 = vld [vmem:[#allocation11 + $0xb0] ss:$12 sps:$4 sm:$0xff]  }
 0x65d   : > { %4140 = vmatprep.subr.bf16.mxu1 %v4978_v7  ;;  %v2561_v14 = vpack.c.bf16 %v2560_v11, %v2560_v11  ;;  %v4700_v11 = vld [vmem:[#allocation11 + $0x158] ss:$12 sps:$4 sm:$0xff]  }
 0x65e   : > { %v4760_v15 = vpop.eup %4759  ;;  %3365 = vmatpush1.bf16.msra.mxu0 %v4652_v37  ;;  %v4707_v37 = vld [vmem:[#allocation11 + $0x180] ss:$12 sps:$4 sm:$0xff]  }
 0x65f   : > { %v2678_v17 = vmul.f32 %v4760_v15, %v4752_v54  ;;  %v4762_v20 = vpop.eup %4761  ;;  %3366 = vmatprep.subr.bf16.mxu0 %v4657_v38  ;;  %v4679_v54 = vld [vmem:[#allocation11 + $0xf4] ss:$12 sps:$4 sm:$0xff]  }
 0x660   : > { %v2797_v22 = vmul.f32 %v4762_v20, %v4750_v51  ;;  %v4667_v51 = vld [vmem:[#allocation11 + $0xc0] ss:$12 sps:$4 sm:$0xff]  }
 0x661   : > { %v2679_v19 = vpack.c.bf16 %v2678_v17, %v2678_v17  ;;  %v4705_v17 = vld [vmem:[#allocation11 + $0x170] ss:$12 sps:$4 sm:$0xff]  }
 0x662   : > { %v2798_v24 = vpack.c.bf16 %v2797_v22, %v2797_v22  ;;  %3367 = vmatpush1.bf16.msra.mxu0 %v4655_v41  ;;  %v4713_v41 = vld [vmem:[#allocation11 + $0x19c] ss:$12 sps:$4 sm:$0xff]  }
 0x663   : > { %4131 = vmatmul.mubr.msk.bf16.vlgmr.msra.gmra.mrb[28].mxu1 %vm2191_vm4, %v2442_v8  ;;  %3368 = vmatprep.subr.bf16.mxu0 %v4660_v42  ;;  %v4697_v8 = vld [vmem:[#allocation11 + $0x150] ss:$12 sps:$4 sm:$0xff]  }
 0x664   : > { %4141 = vmatpush3.bf16.msra.mxu1 %v2571_v10  ;;  %4142 = vmatprep.mubr.msk.bf16.mxu1 %vm4979_vm0, %v4978_v7 }
 0x665   : > { %4152 = vmatprep.subr.bf16.mxu1 %v4978_v7 }
 0x666   : > { %3369 = vmatpush1.bf16.msra.mxu0 %v4658_v45  ;;  %v4717_v45 = vld [vmem:[#allocation11 + $0x1b4] ss:$12 sps:$4 sm:$0xff]  }
 0x667   : > { %3370 = vmatprep.subr.bf16.mxu0 %v4663_v46  ;;  %v4715_v46 = vld [vmem:[#allocation11 + $0x1b0] ss:$12 sps:$4 sm:$0xff]  }
 0x66a   : > { %3371 = vmatpush1.bf16.msra.mxu0 %v4661_v48  ;;  %v4721_v48 = vld [vmem:[#allocation11 + $0x1cc] ss:$12 sps:$4 sm:$0xff]  }
 0x66b   : > { %4143 = vmatmul.mubr.msk.bf16.vlgmr.msra.gmra.mrb[32].mxu1 %vm2191_vm4, %v2561_v14  ;;  %3372 = vmatprep.subr.bf16.mxu0 %v4666_v49  ;;  %v4704_v14 = vld [vmem:[#allocation11 + $0x16c] ss:$12 sps:$4 sm:$0xff]   ;;  %v4719_v49 = vld [vmem:[#allocation11 + $0x1c8] ss:$12 sps:$4 sm:$0xff]  }
 0x66c   : > { %4153 = vmatpush3.bf16.msra.mxu1 %v2684_v16  ;;  %4154 = vmatprep.mubr.msk.bf16.mxu1 %vm4979_vm0, %v4978_v7  ;;  %v4702_v16 = vld [vmem:[#allocation11 + $0x168] ss:$12 sps:$4 sm:$0xff]  }
 0x66d   : > { %4164 = vmatprep.subr.bf16.mxu1 %v4978_v7 }
 0x66e   : > { %3373 = vmatpush1.bf16.msra.mxu0 %v4664_v58  ;;  %v4722_v58 = vld [vmem:[#allocation11 + $0x1d0] ss:$12 sps:$4 sm:$0xff]  }
 0x66f   : > { %3374 = vmatprep.subr.bf16.mxu0 %v4669_v50  ;;  %v4725_v50 = vld [vmem:[#allocation11 + $0x1e4] ss:$12 sps:$4 sm:$0xff]  }
 0x672   : > { %3375 = vmatpush1.bf16.msra.mxu0 %v4667_v51  ;;  %v4726_v51 = vld [vmem:[#allocation11 + $0x1e8] ss:$12 sps:$4 sm:$0xff]  }
 0x673   : > { %4155 = vmatmul.mubr.msk.bf16.vlgmr.msra.gmra.mrb[36].mxu1 %vm2191_vm4, %v2679_v19  ;;  %3376 = vmatprep.subr.bf16.mxu0 %v4674_v52  ;;  %v4709_v19 = vld [vmem:[#allocation11 + $0x184] ss:$12 sps:$4 sm:$0xff]   ;;  %v4729_v52 = vld [vmem:[#allocation11 + $0x1fc] ss:$12 sps:$4 sm:$0xff]  }
 0x674   : > { %4165 = vmatpush3.bf16.msra.mxu1 %v2808_v21  ;;  %4166 = vmatprep.mubr.msk.bf16.mxu1 %vm4979_vm0, %v4978_v7 }
 0x675   : > { %4047 = vmatprep.subr.bf16.mxu1 %v4670_v32 }
 0x676   : > { %3377 = vmatpush1.bf16.msra.mxu0 %v4672_v53  ;;  %v4727_v53 = vld [vmem:[#allocation11 + $0x1f8] ss:$12 sps:$4 sm:$0xff]  }
 0x677   : > { %3378 = vmatprep.subr.bf16.mxu0 %v4679_v54  ;;  %v4730_v54 = vld [vmem:[#allocation11 + $0x200] ss:$12 sps:$4 sm:$0xff]  }
 0x67a   : > { %3379 = vmatpush1.bf16.msra.mxu0 %v4677_v55  ;;  %v4733_v55 = vld [vmem:[#allocation11 + $0x214] ss:$12 sps:$4 sm:$0xff]  }
 0x67b   : > { %4167 = vmatmul.mubr.msk.bf16.vlgmr.msra.gmra.mrb[40].mxu1 %vm2191_vm4, %v2798_v24  ;;  %3380 = vmatprep.subr.bf16.mxu0 %v4684_v56  ;;  %v4731_v56 = vld [vmem:[#allocation11 + $0x210] ss:$12 sps:$4 sm:$0xff]  }
 0x67c   : > { %4048 = vmatpush3.bf16.msra.mxu1 %v4671_v23 }
 0x67d   : > { %4049 = vmatprep.subr.bf16.mxu1 %v4675_v34 }
 0x67e   : > { %3381 = vmatpush1.bf16.msra.mxu0 %v4682_v57  ;;  %v4734_v57 = vld [vmem:[#allocation11 + $0x218] ss:$12 sps:$4 sm:$0xff]  }
 0x67f   : > { %3382 = vmatprep.subr.bf16.mxu0 %v4689_v59  ;;  %v4737_v59 = vld [vmem:[#allocation11 + $0x22c] ss:$12 sps:$4 sm:$0xff]  }
 0x680   : > { %4050 = vmatpush3.bf16.msra.mxu1 %v4676_v36 }
 0x681   : > { %4051 = vmatprep.subr.bf16.mxu1 %v4680_v27 }
 0x682   : > { %3383 = vmatpush1.bf16.msra.mxu0 %v4687_v60  ;;  %v4735_v60 = vld [vmem:[#allocation11 + $0x228] ss:$12 sps:$4 sm:$0xff]  }
 0x683   : > { %3384 = vmatprep.subr.bf16.mxu0 %v4694_v3 }
 0x684   : > { %4052 = vmatpush3.bf16.msra.mxu1 %v4681_v39  ;;  %v4710_v39 = vld [vmem:[#allocation11 + $0x188] ss:$12 sps:$4 sm:$0xff]  }
 0x685   : > { %4053 = vmatprep.subr.bf16.mxu1 %v4685_v40 }
 0x686   : > { %3385 = vmatpush1.bf16.msra.mxu0 %v4692_v2 }
 0x687   : > { %3386 = vmatprep.subr.bf16.mxu0 %v4699_v9  ;;  %v2965_v9 = vsub.s32 1, %v5306_v25 }
 0x688   : > { %4054 = vmatpush3.bf16.msra.mxu1 %v4686_v43  ;;  %v4711_v43 = vld [vmem:[#allocation11 + $0x198] ss:$12 sps:$4 sm:$0xff]  }
 0x689   : > { %4055 = vmatprep.subr.bf16.mxu1 %v4690_v44  ;;  %v4714_v44 = vld [vmem:[#allocation11 + $0x1a0] ss:$12 sps:$4 sm:$0xff]  }
 0x68a   : > { %3387 = vmatpush1.bf16.msra.mxu0 %v4697_v8  ;;  %v2957_v8 = vld [vmem:[%s5467_s4] sm:$0x7] }
 0x68b   : > { %3388 = vmatprep.subr.bf16.mxu0 %v4704_v14 }
 0x68c   : > { %4056 = vmatpush3.bf16.msra.mxu1 %v4691_v47  ;;  %v4718_v47 = vld [vmem:[#allocation11 + $0x1b8] ss:$12 sps:$4 sm:$0xff]  }
 0x68d   : > { %4057 = vmatprep.subr.bf16.mxu1 %v4695_v4 }
 0x68e   : > { %3389 = vmatpush1.bf16.msra.mxu0 %v4702_v16 }
 0x68f   : > { %3399 = vmatprep.subr.bf16.mxu0 %v4709_v19 }
 0x690   : > { %4058 = vmatpush3.bf16.msra.mxu1 %v4696_v5 }
 0x691   : > { %4059 = vmatprep.subr.bf16.mxu1 %v4700_v11 }
 0x694   : > { %4060 = vmatpush3.bf16.msra.mxu1 %v4701_v12  ;;  %v2966_v12 = vrot.slane %v2957_v8, %v2965_v9 }
 0x695   : > { %4061 = vmatprep.subr.bf16.mxu1 %v4705_v17 }
 0x698   : > { %4062 = vmatpush3.bf16.msra.mxu1 %v4706_v18 }
 0x699   : > { %4170 = vmatprep.subr.bf16.mxu1 %v4978_v7 }
 0x72e   : > { %v2369_v61 = vpop.f32.mrb[24].mxu1 }
 0x72f   : > { %v4120_v62 = vpop.f32.mrb[25].mxu1 }
 0x730   : > { %v2372_v63 = vpop.f32.mrb[26].mxu1 }
 0x731   : > { %v4121_v0 = vpop.f32.mrb[27].mxu1 }
 0x736   : > { %v2483_v6 = vpop.f32.mrb[28].mxu1 }
 0x737   : > { %2489 = vst.msk [vmem:[#allocation4 + $0x8] sm:$0xff] %vm2143_vm1, %v2483_v6  ;;  %v4132_v10 = vpop.f32.mrb[29].mxu1  ;;  %v2969_v6 = vsub.s32 2, %v5306_v25 }
 0x738   : > { %v2486_v13 = vpop.f32.mrb[30].mxu1 }
 0x739   : > { %v4133_v15 = vpop.f32.mrb[31].mxu1  ;;  %v2970_v10 = vrot.slane %v2957_v8, %v2969_v6 }
 0x73e   : > { %v2607_v20 = vpop.f32.mrb[32].mxu1 }
 0x73f   : > { %2614 = vrot.lane.b32.xlu1 %v2607_v20, %s4980_s26  ;;  %v4144_v21 = vpop.f32.mrb[33].mxu1 }
 0x740   : > { %v2610_v22 = vpop.f32.mrb[34].mxu1 }
 0x741   : > { %v4145_v24 = vpop.f32.mrb[35].mxu1 }
 0x743   : > { %2376 = vrot.lane.b32.xlu1 %v2369_v61, %s4980_s26  ;;  %v4738_v61 = vld [vmem:[#allocation11 + $0x230] ss:$12 sps:$4 sm:$0xff]  }
 0x746   : > { %v2720_v26 = vpop.f32.mrb[36].mxu1 }
 0x747   : > { %2726 = vst.msk [vmem:[#allocation4 + $0x10] sm:$0xff] %vm2143_vm1, %v2720_v26  ;;  %v4156_v28 = vpop.f32.mrb[37].mxu1 }
 0x748   : > { %v2723_v30 = vpop.f32.mrb[38].mxu1 }
 0x749   : > { %v4157_v29 = vpop.f32.mrb[39].mxu1 }
 0x74e   : > { %v2844_v31 = vpop.f32.mrb[40].mxu1 }
 0x74f   : > { %2851 = vrot.lane.b32.xlu1 %v2844_v31, %s4980_s26  ;;  %v4168_v32 = vpop.f32.mrb[41].mxu1 }
 0x750   : > { %v2847_v23 = vpop.f32.mrb[42].mxu1 }
 0x751   : > { %v4169_v33 = vpop.f32.mrb[43].mxu1 }
 0x7b1   : > { %v2615_v34 = vpop.permute.xlu1 %2614 }
 0x7b2   : > { %2617 = vst.msk [vmem:[#allocation4 + $0x8] sm:$0xff] %vm2379_vm5, %v2615_v34 }
 0x7b5   : > { %v2377_v35 = vpop.permute.xlu1 %2376 }
 0x7b6   : > { %2380 = vst.msk [vmem:[#allocation4] sm:$0xff] %vm2379_vm5, %v2377_v35 }
 0x7b9   : > { %v2856_v36 = vld [vmem:[#allocation4 + $0x8] sm:$0xff] }
 0x7ba   : > { %v2859_v27 = vpack.c.bf16 %v2856_v36, %v2856_v36 }
 0x7bc   : > { %3390 = vmatprep.mubr.bf16.mxu0 %v2859_v27  ;;  %3472 = vmatprep.mubr.bf16.mxu1 %v2859_v27 }
 0x7bd   : > { %v2855_v38 = vld [vmem:[#allocation4] sm:$0xff] }
 0x7be   : > { %v2858_v40 = vpack.c.bf16 %v2855_v38, %v2855_v38 }
 0x7c0   : > { %3391 = vmatmul.mubr.bf16.vlgmr.msra.gmra.mrb[28].mxu0 %v2858_v40  ;;  %3473 = vmatmul.mubr.bf16.vlgmr.msra.gmra.mrb[44].mxu1 %v2858_v40 }
 0x7c1   : > { %3400 = vmatpush1.bf16.msra.mxu0 %v4707_v37  ;;  %4171 = vmatpush3.bf16.msra.mxu1 %v4710_v39  ;;  %v2852_v42 = vpop.permute.xlu1 %2851 }
 0x7c2   : > { %2854 = vst.msk [vmem:[#allocation4 + $0x10] sm:$0xff] %vm2379_vm5, %v2852_v42  ;;  %3401 = vmatprep.subr.bf16.mxu0 %v4713_v41  ;;  %4172 = vmatprep.subr.bf16.mxu1 %v4978_v7 }
 0x7c3   : > { %3431 = vmatprep.mubr.bf16.mxu0 %v4977_v1  ;;  %4186 = vmatprep.mubr.msk.bf16.mxu1 %vm4979_vm0, %v4978_v7  ;;  %v4723_v1 = vld [vmem:[#allocation11 + $0x1e0] ss:$12 sps:$4 sm:$0xff]  }
 0x7c5   : > { %3402 = vmatpush1.bf16.msra.mxu0 %v4711_v43  ;;  %4173 = vmatpush3.bf16.msra.mxu1 %v4714_v44 }
 0x7c6   : > { %3403 = vmatprep.subr.bf16.mxu0 %v4717_v45  ;;  %4174 = vmatprep.subr.bf16.mxu1 %v4978_v7 }
 0x7c9   : > { %3404 = vmatpush1.bf16.msra.mxu0 %v4715_v46  ;;  %4175 = vmatpush3.bf16.msra.mxu1 %v4718_v47  ;;  %v2857_v62 = vld [vmem:[#allocation4 + $0x10] sm:$0xff] }
 0x7ca   : > { %3405 = vmatprep.subr.bf16.mxu0 %v4721_v48  ;;  %4176 = vmatprep.subr.bf16.mxu1 %v4978_v7  ;;  %v2860_v63 = vpack.c.bf16 %v2857_v62, %v2857_v62 }
 0x7cd   : > { %3406 = vmatpush1.bf16.msra.mxu0 %v4719_v49  ;;  %4177 = vmatpush3.bf16.msra.mxu1 %v4722_v58 }
 0x7ce   : > { %3407 = vmatprep.subr.bf16.mxu0 %v4725_v50  ;;  %4178 = vmatprep.subr.bf16.mxu1 %v4978_v7 }
 0x7d1   : > { %3408 = vmatpush1.bf16.msra.mxu0 %v4723_v1  ;;  %4179 = vmatpush3.bf16.msra.mxu1 %v4726_v51 }
 0x7d2   : > { %3409 = vmatprep.subr.bf16.mxu0 %v4729_v52  ;;  %4180 = vmatprep.subr.bf16.mxu1 %v4978_v7 }
 0x7d5   : > { %3410 = vmatpush1.bf16.msra.mxu0 %v4727_v53  ;;  %4181 = vmatpush3.bf16.msra.mxu1 %v4730_v54 }
 0x7d6   : > { %3411 = vmatprep.subr.bf16.mxu0 %v4733_v55  ;;  %4182 = vmatprep.subr.bf16.mxu1 %v4978_v7 }
 0x7d9   : > { %3412 = vmatpush1.bf16.msra.mxu0 %v4731_v56  ;;  %4183 = vmatpush3.bf16.msra.mxu1 %v4734_v57 }
 0x7da   : > { %3413 = vmatprep.subr.bf16.mxu0 %v4737_v59  ;;  %4184 = vmatprep.subr.bf16.mxu1 %v4978_v7  ;;  %v2961_v7 = vsub.s32 0, %v5306_v25 }
 0x7dc   : > { %v2962_v11 = vrot.slane %v2957_v8, %v2961_v7 }
 0x7dd   : > { %3414 = vmatpush1.bf16.msra.mxu0 %v4735_v60  ;;  %4185 = vmatpush3.bf16.msra.mxu1 %v4738_v61 }
 0x7e0   : > { %3432 = vmatmul.mubr.bf16.vlgmr.msra.gmra.mrb[28].mxu0 %v2860_v63  ;;  %4187 = vmatmul.mubr.bf16.vlgmr.msra.gmra.mrb[48].mxu1 %v2860_v63 }
 0x893   : > { %v4063_v0 = vpop.f32.mrb[44].mxu1 }
 0x894   : > { %v4064_v2 = vpop.f32.mrb[45].mxu1 }
 0x895   : > { %v4065_v3 = vadd.f32 %v4064_v2, %v4063_v0  ;;  %v4066_v4 = vpop.f32.mrb[46].mxu1 }
 0x896   : > { %v4067_v5 = vpop.f32.mrb[47].mxu1 }
 0x897   : > { %v3475_v13 = vadd.f32 %v4065_v3, %v2970_v10 }
 0x8b3   : > { %v3433_v14 = vpop.f32.mrb[28].mxu0  ;;  %v3514_v15 = vpop.f32.mrb[48].mxu1 }
 0x8b4   : > { %v4190_v16 = vadd.f32 %v3433_v14, %v2962_v11  ;;  %v3515_v17 = vadd.f32 %v3514_v15, %v3475_v13  ;;  %v3435_v18 = vpop.f32.mrb[29].mxu0  ;;  %v4188_v19 = vpop.f32.mrb[49].mxu1 }
 0x8b5   : > { %v4191_v20 = vadd.f32 %v3435_v18, %v2966_v12  ;;  %v3437_v21 = vpop.f32.mrb[30].mxu0  ;;  %v3517_v22 = vpop.f32.mrb[50].mxu1 }
 0x8b6   : > { %3520 = vst [vmem:[%s298_s6] sm:$0xff] %v4190_v16  ;;  %3522 = vst [vmem:[%s298_s6 + $0x10] sm:$0xff] %v3515_v17  ;;  %v3438_v25 = vpop.f32.mrb[31].mxu0  ;;  %v4189_v24 = vpop.f32.mrb[51].mxu1 }
 0x8b7   : > { %3521 = vst [vmem:[%s298_s6 + $0x8] sm:$0xff] %v4191_v20 }
 0x8b8   : > { %4890 = shalt.err (!%p4887_p0)
}
 0x8b9   : > { %s4891_s1 = scalar_lea.hbm %s5414_s13, 384  ;;  %s4895_s26 = scalar_lea.hbm %s5468_s5, 768 }
 0x8ba   : > { %p4892_p4 = scmp.ne.s32.totalorder %s5414_s13, %s4891_s1  ;;  %p4896_p1 = scmp.lt.u32.totalorder %s5414_s13, %s5468_s5 }
 0x8bb   : > { %p4897_p12 = scmp.lt.u32.totalorder %s4895_s26, %s4891_s1  ;;  %p4899_p13 = scmp.lt.u32.totalorder %s4891_s1, %s5414_s13 }
 0x8bc   : > { %p4893_p2 = pnand %p4892_p4, %p5168_p3 }
 0x8bd   : > { %p4898_p11 = por %p4897_p12, %p4896_p1 }
 0x8be   : > { %p4894_p8 = pneg %p4893_p2 }
 0x8bf   : > { %p4900_p6 = por %p4899_p13, %p4898_p11 }
 0x8c1   : > { %p4901_p10 = pnand %p4900_p6, %p4894_p8 }
 0x8c3   : > { %4904 = shalt.err (!%p4901_p10)
}
 0x8c4   : > { %4231 = dma.vmem_to_hbm [thread:$0]  (%p5168_p3), %s5416_s11, 384, %s5414_s13, %s3524_s21  }
 0x8c5 PF: > { %s5496_s25 = sld [smem:[#allocation18_spill]]  ;;  %s3552_s7 = sand.u32 1, %s4947_s18  }
 0x8c6   : > { %p5498_p7 = scmp.ge.s32.totalorder %s4967_s23, 2  ;;  %s3553_s6 = scalar_lea.sflag [#allocation7], %s3552_s7 }
 0x8cb   : > { %p5497_p5 = scmp.ne.s32.totalorder %s5496_s25, 0 }
 0x8cd   : > { %p4248_p9 = pnand %p5498_p7, %p5497_p5 }
 0x8cf   : > { %4942 = dma.done.wait (!%p4248_p9), %s3553_s6, 384  }
 0x8d0   : > { %4944 = vsyncadd (!%p4248_p9), %s3553_s6, 4294966912  ;;  %s23_s23 = sadd.s32 1, %s4967_s23   ;;  %s5499_s18 = smov %s4951_s19 }
 0x8d1   : > { %p20_p0 = scmp.ge.s32.totalorder %s23_s23, 4   ;;  %s5500_s19 = smov %s4955_s20 }
 0x8d2   : > { %s5501_s20 = smov %s5177_s15  ;;  %s5502_s21 = smov %s4963_s22 }
 0x8d3   : > { %s5503_s22 = smov %s5505_s16  ;;  %22 = sbr.rel (!%p20_p0) target bundleno = 10 (0xa), region = 102 }
 0x8da   :  { %3558 = vsyncpa [#allocation6], 1 }
 0x8db   :  { %3560 = vsyncpa [#allocation6 + $0x1], 1 }
 0x8dc   :  { %3561 = vsyncpa [#allocation9], 1 }
 0x8dd   :  { %3562 = vsyncpa [#allocation12], 1 }
 0x8de   :  { %3563 = vsyncpa [#allocation7], 1 }
 0x8df   :  { %3565 = vsyncpa [#allocation7 + $0x1], 1 }

</bundles_post_ra>
